<compile_context>
chip_gen: v6e
topology: v6e:2x2x1
jax: 0.10.0
libtpu: 0.0.40
codegen_flags: <defaults>
</compile_context>

<pallas_src>
import numpy as np
import jax
import jax.numpy as jnp
from jax.experimental import pallas as pl
from jax.experimental.pallas import tpu as pltpu

KH = KW = 5
HALF = 128                     # lane width of each pool-parity half (128-aligned)
NF_PAD = 128                   # lane-dense padded width of the fc output

# Static stage geometry for 28x28 inputs (needed so the flatten gives 320 features).
H1, W1, C1 = 28, 28, 10        # conv1: 28x28x1  -> 24x24x10 -> pool -> 12x12x10
H2, W2, C2 = 12, 12, 20        # conv2: 12x12x10 -> 8x8x20   -> pool -> 4x4x20
HO1, WO1 = H1 - KH + 1, W1 - KW + 1      # 24, 24
HO2, WO2 = H2 - KH + 1, W2 - KW + 1      # 8, 8


# ---------------------------------------------------------------------------
# Fused Pallas kernel: conv1+ReLU+pool -> conv2+ReLU+pool -> folded fc
# One grid step = one image; all intermediates live in VMEM/vregs.
# ---------------------------------------------------------------------------
def net_kernel(x_ref, t1_ref, b1_ref, s1_ref, t2_ref, b2_ref, s2_ref,
               wf_ref, bf_ref, o_ref):
    f32 = jnp.float32

    def conv_relu_pool(a, t_ref, b_ref, s_ref, ho):
        # a:     (hi, k) activation, lane index = w*cin + c (k possibly zero-padded)
        # t_ref: (KH, k, 2*HALF) banded conv weights; lanes = (ow parity, ow//2, cout)
        # b_ref: (1, 2*HALF) lane-tiled bias; s_ref: (2, ho//2, ho) 0/1 row selectors
        acc = jnp.dot(a[0:ho, :], t_ref[0], preferred_element_type=f32)
        for kh in range(1, KH):
            acc = acc + jnp.dot(a[kh:kh + ho, :], t_ref[kh],
                                preferred_element_type=f32)
        y = jnp.maximum(acc + b_ref[...], 0.0)                  # bias + ReLU
        cp = jnp.maximum(y[:, :HALF], y[:, HALF:])              # max-pool along width
        return jnp.maximum(                                     # max-pool along height
            jnp.dot(s_ref[0], cp, preferred_element_type=f32),
            jnp.dot(s_ref[1], cp, preferred_element_type=f32))

    x = x_ref[0]                                                # (28, 28); Cin == 1
    p1 = conv_relu_pool(x, t1_ref, b1_ref, s1_ref, HO1)         # (12, 128); 120 valid
    p2 = conv_relu_pool(p1, t2_ref, b2_ref, s2_ref, HO2)        # (4, 128);  80 valid

    # Folded fc: wf rows are ordered (h, w*C2 + c) to match p2's layout.
    wf = wf_ref[...]                                            # (4*HALF, NF_PAD)
    acc = bf_ref[...]                                           # (1, NF_PAD)
    for r in range(HO2 // 2):                                   # 4 pooled rows
        acc = acc + jnp.dot(p2[r:r + 1, :], wf[r * HALF:(r + 1) * HALF, :],
                            preferred_element_type=f32)
    o_ref[0] = acc


# ---------------------------------------------------------------------------
# Wrapper-side weight preprocessing (tiny, amortizable; pure data rearrangement)
# ---------------------------------------------------------------------------
def _toeplitz_bank(w, wi, k_rows):
    """Conv weight (cout,cin,5,5) -> (KH, k_rows, 2*HALF) banded matmul bank.

    bank[kh][win*cin + ci, par*HALF + (ow//2)*cout + co] = w[co, ci, kh, win - ow]
    with ow = 2*(ow//2) + par and 0 <= win - ow < KW, else 0.  Extra rows/lanes are 0.
    """
    cout, cin, _, _ = w.shape
    wo = wi - KW + 1
    win = jnp.arange(wi)[:, None]                   # (wi, 1)
    ow = jnp.arange(wo)[None, :]                    # (1, wo)
    kw_idx = win - ow                               # (wi, wo)
    valid = (kw_idx >= 0) & (kw_idx < KW)
    kw_idx = jnp.clip(kw_idx, 0, KW - 1)
    banks = []
    for kh in range(KH):
        g = w[:, :, kh, :][:, :, kw_idx]            # (cout, cin, wi, wo)
        g = jnp.where(valid[None, None], g, 0.0)
        g = g.transpose(2, 1, 3, 0)                 # (wi, cin, wo, cout)
        halves = []
        for par in (0, 1):                          # even-ow lanes, then odd-ow lanes
            gp = g[:, :, par::2, :].reshape(wi * cin, (wo // 2) * cout)
            halves.append(jnp.pad(gp, ((0, 0), (0, HALF - gp.shape[1]))))
        bank = jnp.concatenate(halves, axis=1)      # (wi*cin, 2*HALF)
        bank = jnp.pad(bank, ((0, k_rows - wi * cin), (0, 0)))
        banks.append(bank)
    return jnp.stack(banks, axis=0)


def _bias_lanes(b, wo):
    bh = jnp.tile(b, wo // 2)                       # ((wo//2)*cout,)
    bh = jnp.pad(bh, (0, HALF - bh.shape[0]))
    return jnp.concatenate([bh, bh]).reshape(1, 2 * HALF)


def _row_pool_select(ho):
    i = jnp.arange(ho // 2)[:, None]
    j = jnp.arange(ho)[None, :]
    even = (j == 2 * i).astype(jnp.float32)
    odd = (j == 2 * i + 1).astype(jnp.float32)
    return jnp.stack([even, odd], axis=0)           # (2, ho//2, ho)


def _prep_params(p):
    t1 = _toeplitz_bank(p['w1'], W1, W1)            # (5, 28, 256)
    t2 = _toeplitz_bank(p['w2'], W2, HALF)          # (5, 128, 256)
    b1 = _bias_lanes(p['b1'], WO1)                  # (1, 256)
    b2 = _bias_lanes(p['b2'], WO2)                  # (1, 256)
    s1 = _row_pool_select(HO1)                      # (2, 12, 24)
    s2 = _row_pool_select(HO2)                      # (2, 4, 8)
    # Fold the two ReLU-free Linears into one, reordering fc1 rows from PyTorch's
    # (c, h, w) flatten order to the kernel's (h, w*C2 + c) layout, with each pooled
    # row's feature block zero-padded to HALF to match p2's padded lanes.
    hp2, wp2 = HO2 // 2, WO2 // 2                   # 4, 4
    fw1 = p['fw1'].reshape(C2, hp2, wp2, -1).transpose(1, 2, 0, 3)   # (h, w, c, 50)
    fw1 = fw1.reshape(hp2, wp2 * C2, -1)                             # (4, 80, 50)
    fw1 = jnp.pad(fw1, ((0, 0), (0, HALF - wp2 * C2), (0, 0)))       # (4, 128, 50)
    fw1 = fw1.reshape(hp2 * HALF, -1)                                # (512, 50)
    hiprec = jax.lax.Precision.HIGHEST
    wf = jnp.dot(fw1, p['fw2'], precision=hiprec)                    # (512, 10)
    bf = jnp.dot(p['fb1'], p['fw2'], precision=hiprec) + p['fb2']    # (1, 10)
    nout = wf.shape[1]
    wf = jnp.pad(wf, ((0, 0), (0, NF_PAD - nout)))
    bf = jnp.pad(bf, ((0, 0), (0, NF_PAD - nout)))
    return (t1, b1, s1, t2, b2, s2, wf, bf), nout


def _full_spec(shape):
    nd = len(shape)
    return pl.BlockSpec(shape, lambda i, _nd=nd: (0,) * _nd)


@jax.jit
def net_forward(x, params):
    b = x.shape[0]
    (t1, b1, s1, t2, b2, s2, wf, bf), nout = _prep_params(params)
    x3 = x.reshape(b, H1, W1)                       # Cin == 1: drop the channel axis
    out = pl.pallas_call(
        net_kernel,
        out_shape=jax.ShapeDtypeStruct((b, 1, NF_PAD), jnp.float32),
        grid=(b,),
        in_specs=[pl.BlockSpec((1, H1, W1), lambda i: (i, 0, 0)),
                  _full_spec(t1.shape), _full_spec(b1.shape), _full_spec(s1.shape),
                  _full_spec(t2.shape), _full_spec(b2.shape), _full_spec(s2.shape),
                  _full_spec(wf.shape), _full_spec(bf.shape)],
        out_specs=pl.BlockSpec((1, 1, NF_PAD), lambda i: (i, 0, 0)),
        compiler_params=pltpu.CompilerParams(dimension_semantics=("parallel",)),
    )(x3, t1, b1, s1, t2, b2, s2, wf, bf)
    return out[:, 0, :nout]


# ---------------------------------------------------------------------------
# Pure-JAX reference (matches the PyTorch module semantics)
# ---------------------------------------------------------------------------
def ref_forward(x, p):
    def stage(x, w, b):
        y = jax.lax.conv_general_dilated(
            x, w, (1, 1), 'VALID', dimension_numbers=('NCHW', 'OIHW', 'NCHW'))
        y = jnp.maximum(y + b[None, :, None, None], 0.0)
        return jax.lax.reduce_window(y, -jnp.inf, jax.lax.max,
                                     (1, 1, 2, 2), (1, 1, 2, 2), 'VALID')
    y = stage(x, p['w1'], p['b1'])
    y = stage(y, p['w2'], p['b2'])
    y = y.reshape(x.shape[0], -1)
    y = y @ p['fw1'] + p['fb1']
    return y @ p['fw2'] + p['fb2']


if __name__ == "__main__":
    key = jax.random.PRNGKey(0)
    ks = jax.random.split(key, 9)
    B = 2
    # 28x28 input is required so the flattened conv2 output is 320 (= Linear in-features).
    x = jax.random.normal(ks[0], (B, 1, 28, 28), jnp.float32)
    # Linear layers are stored in "math" layout: out = act @ fw + fb (fw = W.T of PyTorch).
    params = {
        'w1': 0.1 * jax.random.normal(ks[1], (10, 1, 5, 5), jnp.float32),
        'b1': 0.1 * jax.random.normal(ks[2], (10,), jnp.float32),
        'w2': 0.1 * jax.random.normal(ks[3], (20, 10, 5, 5), jnp.float32),
        'b2': 0.1 * jax.random.normal(ks[4], (20,), jnp.float32),
        'fw1': 0.05 * jax.random.normal(ks[5], (320, 50), jnp.float32),
        'fb1': 0.05 * jax.random.normal(ks[6], (1, 50), jnp.float32),
        'fw2': 0.05 * jax.random.normal(ks[7], (50, 10), jnp.float32),
        'fb2': 0.05 * jax.random.normal(ks[8], (1, 10), jnp.float32),
    }

    out = jax.block_until_ready(net_forward(x, params))
    ref = jax.block_until_ready(ref_forward(x, params))
    assert out.shape == (B, 10)
    # Tolerance is slightly looser than before because the two ReLU-free Linears are
    # folded into one matmul (exact in math, different f32 rounding path).
    np.testing.assert_allclose(np.asarray(out), np.asarray(ref), rtol=1e-3, atol=1e-3)
    print("KERNEL_OK")
</pallas_src>

<mosaic_0001>
module attributes {stable_mosaic.version = 11 : i64} {
  func.func @net_kernel(%arg0: i32, %arg1: memref<1x28x28xf32, #tpu.memory_space<vmem>>, %arg2: memref<5x28x256xf32, #tpu.memory_space<vmem>>, %arg3: memref<1x256xf32, #tpu.memory_space<vmem>>, %arg4: memref<2x12x24xf32, #tpu.memory_space<vmem>>, %arg5: memref<5x128x256xf32, #tpu.memory_space<vmem>>, %arg6: memref<1x256xf32, #tpu.memory_space<vmem>>, %arg7: memref<2x4x8xf32, #tpu.memory_space<vmem>>, %arg8: memref<512x128xf32, #tpu.memory_space<vmem>>, %arg9: memref<1x128xf32, #tpu.memory_space<vmem>>, %arg10: memref<1x1x128xf32, #tpu.memory_space<vmem>>) attributes {dimension_semantics = [#tpu.dimension_semantics<parallel>], iteration_bounds = array<i64: 2>, scalar_prefetch = 0 : i64, scratch_operands = 0 : i64, tpu.core_type = #tpu.core_type<tc>, window_params = [{transform_indices = @transform_0, window_bounds = array<i64: 1, 28, 28>}, {pipeline_mode = #tpu.pipeline_mode<synchronous>, transform_indices = @transform_1, window_bounds = array<i64: 5, 28, 256>}, {pipeline_mode = #tpu.pipeline_mode<synchronous>, transform_indices = @transform_2, window_bounds = array<i64: 1, 256>}, {pipeline_mode = #tpu.pipeline_mode<synchronous>, transform_indices = @transform_3, window_bounds = array<i64: 2, 12, 24>}, {pipeline_mode = #tpu.pipeline_mode<synchronous>, transform_indices = @transform_4, window_bounds = array<i64: 5, 128, 256>}, {pipeline_mode = #tpu.pipeline_mode<synchronous>, transform_indices = @transform_5, window_bounds = array<i64: 1, 256>}, {pipeline_mode = #tpu.pipeline_mode<synchronous>, transform_indices = @transform_6, window_bounds = array<i64: 2, 4, 8>}, {pipeline_mode = #tpu.pipeline_mode<synchronous>, transform_indices = @transform_7, window_bounds = array<i64: 512, 128>}, {pipeline_mode = #tpu.pipeline_mode<synchronous>, transform_indices = @transform_8, window_bounds = array<i64: 1, 128>}, {transform_indices = @transform_9, window_bounds = array<i64: 1, 1, 128>}]} {
    %c0 = arith.constant 0 : index
    %c0_0 = arith.constant 0 : index
    %c0_1 = arith.constant 0 : index
    %0 = vector.load %arg1[%c0, %c0_0, %c0_1] : memref<1x28x28xf32, #tpu.memory_space<vmem>>, vector<1x28x28xf32>
    %1 = vector.shape_cast %0 : vector<1x28x28xf32> to vector<28x28xf32>
    %2 = vector.extract_strided_slice %1 {offsets = [0, 0], sizes = [24, 28], strides = [1, 1]} : vector<28x28xf32> to vector<24x28xf32>
    %c0_2 = arith.constant 0 : index
    %c0_3 = arith.constant 0 : index
    %c0_4 = arith.constant 0 : index
    %3 = vector.load %arg2[%c0_2, %c0_3, %c0_4] : memref<5x28x256xf32, #tpu.memory_space<vmem>>, vector<1x28x256xf32>
    %4 = vector.shape_cast %3 : vector<1x28x256xf32> to vector<28x256xf32>
    %cst = arith.constant dense<0.000000e+00> : vector<24x256xf32>
    %5 = tpu.matmul %2, %4, %cst {dimension_numbers = #tpu.dot_dimension_numbers<[1], [0], [0], [1], [0, 0, 1, 1], [], []>} : vector<24x28xf32>, vector<28x256xf32>, vector<24x256xf32> -> vector<24x256xf32>
    %6 = vector.extract_strided_slice %1 {offsets = [1, 0], sizes = [24, 28], strides = [1, 1]} : vector<28x28xf32> to vector<24x28xf32>
    %c1 = arith.constant 1 : index
    %c0_5 = arith.constant 0 : index
    %c0_6 = arith.constant 0 : index
    %7 = vector.load %arg2[%c1, %c0_5, %c0_6] : memref<5x28x256xf32, #tpu.memory_space<vmem>>, vector<1x28x256xf32>
    %8 = vector.shape_cast %7 : vector<1x28x256xf32> to vector<28x256xf32>
    %cst_7 = arith.constant dense<0.000000e+00> : vector<24x256xf32>
    %9 = tpu.matmul %6, %8, %cst_7 {dimension_numbers = #tpu.dot_dimension_numbers<[1], [0], [0], [1], [0, 0, 1, 1], [], []>} : vector<24x28xf32>, vector<28x256xf32>, vector<24x256xf32> -> vector<24x256xf32>
    %10 = arith.addf %5, %9 : vector<24x256xf32>
    %11 = vector.extract_strided_slice %1 {offsets = [2, 0], sizes = [24, 28], strides = [1, 1]} : vector<28x28xf32> to vector<24x28xf32>
    %c2 = arith.constant 2 : index
    %c0_8 = arith.constant 0 : index
    %c0_9 = arith.constant 0 : index
    %12 = vector.load %arg2[%c2, %c0_8, %c0_9] : memref<5x28x256xf32, #tpu.memory_space<vmem>>, vector<1x28x256xf32>
    %13 = vector.shape_cast %12 : vector<1x28x256xf32> to vector<28x256xf32>
    %cst_10 = arith.constant dense<0.000000e+00> : vector<24x256xf32>
    %14 = tpu.matmul %11, %13, %cst_10 {dimension_numbers = #tpu.dot_dimension_numbers<[1], [0], [0], [1], [0, 0, 1, 1], [], []>} : vector<24x28xf32>, vector<28x256xf32>, vector<24x256xf32> -> vector<24x256xf32>
    %15 = arith.addf %10, %14 : vector<24x256xf32>
    %16 = vector.extract_strided_slice %1 {offsets = [3, 0], sizes = [24, 28], strides = [1, 1]} : vector<28x28xf32> to vector<24x28xf32>
    %c3 = arith.constant 3 : index
    %c0_11 = arith.constant 0 : index
    %c0_12 = arith.constant 0 : index
    %17 = vector.load %arg2[%c3, %c0_11, %c0_12] : memref<5x28x256xf32, #tpu.memory_space<vmem>>, vector<1x28x256xf32>
    %18 = vector.shape_cast %17 : vector<1x28x256xf32> to vector<28x256xf32>
    %cst_13 = arith.constant dense<0.000000e+00> : vector<24x256xf32>
    %19 = tpu.matmul %16, %18, %cst_13 {dimension_numbers = #tpu.dot_dimension_numbers<[1], [0], [0], [1], [0, 0, 1, 1], [], []>} : vector<24x28xf32>, vector<28x256xf32>, vector<24x256xf32> -> vector<24x256xf32>
    %20 = arith.addf %15, %19 : vector<24x256xf32>
    %21 = vector.extract_strided_slice %1 {offsets = [4, 0], sizes = [24, 28], strides = [1, 1]} : vector<28x28xf32> to vector<24x28xf32>
    %c4 = arith.constant 4 : index
    %c0_14 = arith.constant 0 : index
    %c0_15 = arith.constant 0 : index
    %22 = vector.load %arg2[%c4, %c0_14, %c0_15] : memref<5x28x256xf32, #tpu.memory_space<vmem>>, vector<1x28x256xf32>
    %23 = vector.shape_cast %22 : vector<1x28x256xf32> to vector<28x256xf32>
    %cst_16 = arith.constant dense<0.000000e+00> : vector<24x256xf32>
    %24 = tpu.matmul %21, %23, %cst_16 {dimension_numbers = #tpu.dot_dimension_numbers<[1], [0], [0], [1], [0, 0, 1, 1], [], []>} : vector<24x28xf32>, vector<28x256xf32>, vector<24x256xf32> -> vector<24x256xf32>
    %25 = arith.addf %20, %24 : vector<24x256xf32>
    %c0_17 = arith.constant 0 : index
    %c0_18 = arith.constant 0 : index
    %26 = vector.load %arg3[%c0_17, %c0_18] : memref<1x256xf32, #tpu.memory_space<vmem>>, vector<1x256xf32>
    %27 = vector.broadcast %26 : vector<1x256xf32> to vector<24x256xf32>
    %28 = arith.addf %25, %27 : vector<24x256xf32>
    %cst_19 = arith.constant 0.000000e+00 : f32
    %29 = vector.broadcast %cst_19 : f32 to vector<24x256xf32>
    %30 = arith.maximumf %28, %29 : vector<24x256xf32>
    %31 = vector.extract_strided_slice %30 {offsets = [0, 0], sizes = [24, 128], strides = [1, 1]} : vector<24x256xf32> to vector<24x128xf32>
    %32 = vector.extract_strided_slice %30 {offsets = [0, 128], sizes = [24, 128], strides = [1, 1]} : vector<24x256xf32> to vector<24x128xf32>
    %33 = arith.maximumf %31, %32 : vector<24x128xf32>
    %c0_20 = arith.constant 0 : index
    %c0_21 = arith.constant 0 : index
    %c0_22 = arith.constant 0 : index
    %34 = vector.load %arg4[%c0_20, %c0_21, %c0_22] : memref<2x12x24xf32, #tpu.memory_space<vmem>>, vector<1x12x24xf32>
    %35 = vector.shape_cast %34 : vector<1x12x24xf32> to vector<12x24xf32>
    %cst_23 = arith.constant dense<0.000000e+00> : vector<12x128xf32>
    %36 = tpu.matmul %35, %33, %cst_23 {dimension_numbers = #tpu.dot_dimension_numbers<[1], [0], [0], [1], [0, 0, 1, 1], [], []>} : vector<12x24xf32>, vector<24x128xf32>, vector<12x128xf32> -> vector<12x128xf32>
    %c1_24 = arith.constant 1 : index
    %c0_25 = arith.constant 0 : index
    %c0_26 = arith.constant 0 : index
    %37 = vector.load %arg4[%c1_24, %c0_25, %c0_26] : memref<2x12x24xf32, #tpu.memory_space<vmem>>, vector<1x12x24xf32>
    %38 = vector.shape_cast %37 : vector<1x12x24xf32> to vector<12x24xf32>
    %cst_27 = arith.constant dense<0.000000e+00> : vector<12x128xf32>
    %39 = tpu.matmul %38, %33, %cst_27 {dimension_numbers = #tpu.dot_dimension_numbers<[1], [0], [0], [1], [0, 0, 1, 1], [], []>} : vector<12x24xf32>, vector<24x128xf32>, vector<12x128xf32> -> vector<12x128xf32>
    %40 = arith.maximumf %36, %39 : vector<12x128xf32>
    %41 = vector.extract_strided_slice %40 {offsets = [0, 0], sizes = [8, 128], strides = [1, 1]} : vector<12x128xf32> to vector<8x128xf32>
    %c0_28 = arith.constant 0 : index
    %c0_29 = arith.constant 0 : index
    %c0_30 = arith.constant 0 : index
    %42 = vector.load %arg5[%c0_28, %c0_29, %c0_30] : memref<5x128x256xf32, #tpu.memory_space<vmem>>, vector<1x128x256xf32>
    %43 = vector.shape_cast %42 : vector<1x128x256xf32> to vector<128x256xf32>
    %cst_31 = arith.constant dense<0.000000e+00> : vector<8x256xf32>
    %44 = tpu.matmul %41, %43, %cst_31 {dimension_numbers = #tpu.dot_dimension_numbers<[1], [0], [0], [1], [0, 0, 1, 1], [], []>} : vector<8x128xf32>, vector<128x256xf32>, vector<8x256xf32> -> vector<8x256xf32>
    %45 = vector.extract_strided_slice %40 {offsets = [1, 0], sizes = [8, 128], strides = [1, 1]} : vector<12x128xf32> to vector<8x128xf32>
    %c1_32 = arith.constant 1 : index
    %c0_33 = arith.constant 0 : index
    %c0_34 = arith.constant 0 : index
    %46 = vector.load %arg5[%c1_32, %c0_33, %c0_34] : memref<5x128x256xf32, #tpu.memory_space<vmem>>, vector<1x128x256xf32>
    %47 = vector.shape_cast %46 : vector<1x128x256xf32> to vector<128x256xf32>
    %cst_35 = arith.constant dense<0.000000e+00> : vector<8x256xf32>
    %48 = tpu.matmul %45, %47, %cst_35 {dimension_numbers = #tpu.dot_dimension_numbers<[1], [0], [0], [1], [0, 0, 1, 1], [], []>} : vector<8x128xf32>, vector<128x256xf32>, vector<8x256xf32> -> vector<8x256xf32>
    %49 = arith.addf %44, %48 : vector<8x256xf32>
    %50 = vector.extract_strided_slice %40 {offsets = [2, 0], sizes = [8, 128], strides = [1, 1]} : vector<12x128xf32> to vector<8x128xf32>
    %c2_36 = arith.constant 2 : index
    %c0_37 = arith.constant 0 : index
    %c0_38 = arith.constant 0 : index
    %51 = vector.load %arg5[%c2_36, %c0_37, %c0_38] : memref<5x128x256xf32, #tpu.memory_space<vmem>>, vector<1x128x256xf32>
    %52 = vector.shape_cast %51 : vector<1x128x256xf32> to vector<128x256xf32>
    %cst_39 = arith.constant dense<0.000000e+00> : vector<8x256xf32>
    %53 = tpu.matmul %50, %52, %cst_39 {dimension_numbers = #tpu.dot_dimension_numbers<[1], [0], [0], [1], [0, 0, 1, 1], [], []>} : vector<8x128xf32>, vector<128x256xf32>, vector<8x256xf32> -> vector<8x256xf32>
    %54 = arith.addf %49, %53 : vector<8x256xf32>
    %55 = vector.extract_strided_slice %40 {offsets = [3, 0], sizes = [8, 128], strides = [1, 1]} : vector<12x128xf32> to vector<8x128xf32>
    %c3_40 = arith.constant 3 : index
    %c0_41 = arith.constant 0 : index
    %c0_42 = arith.constant 0 : index
    %56 = vector.load %arg5[%c3_40, %c0_41, %c0_42] : memref<5x128x256xf32, #tpu.memory_space<vmem>>, vector<1x128x256xf32>
    %57 = vector.shape_cast %56 : vector<1x128x256xf32> to vector<128x256xf32>
    %cst_43 = arith.constant dense<0.000000e+00> : vector<8x256xf32>
    %58 = tpu.matmul %55, %57, %cst_43 {dimension_numbers = #tpu.dot_dimension_numbers<[1], [0], [0], [1], [0, 0, 1, 1], [], []>} : vector<8x128xf32>, vector<128x256xf32>, vector<8x256xf32> -> vector<8x256xf32>
    %59 = arith.addf %54, %58 : vector<8x256xf32>
    %60 = vector.extract_strided_slice %40 {offsets = [4, 0], sizes = [8, 128], strides = [1, 1]} : vector<12x128xf32> to vector<8x128xf32>
    %c4_44 = arith.constant 4 : index
    %c0_45 = arith.constant 0 : index
    %c0_46 = arith.constant 0 : index
    %61 = vector.load %arg5[%c4_44, %c0_45, %c0_46] : memref<5x128x256xf32, #tpu.memory_space<vmem>>, vector<1x128x256xf32>
    %62 = vector.shape_cast %61 : vector<1x128x256xf32> to vector<128x256xf32>
    %cst_47 = arith.constant dense<0.000000e+00> : vector<8x256xf32>
    %63 = tpu.matmul %60, %62, %cst_47 {dimension_numbers = #tpu.dot_dimension_numbers<[1], [0], [0], [1], [0, 0, 1, 1], [], []>} : vector<8x128xf32>, vector<128x256xf32>, vector<8x256xf32> -> vector<8x256xf32>
    %64 = arith.addf %59, %63 : vector<8x256xf32>
    %c0_48 = arith.constant 0 : index
    %c0_49 = arith.constant 0 : index
    %65 = vector.load %arg6[%c0_48, %c0_49] : memref<1x256xf32, #tpu.memory_space<vmem>>, vector<1x256xf32>
    %66 = vector.broadcast %65 : vector<1x256xf32> to vector<8x256xf32>
    %67 = arith.addf %64, %66 : vector<8x256xf32>
    %cst_50 = arith.constant 0.000000e+00 : f32
    %68 = vector.broadcast %cst_50 : f32 to vector<8x256xf32>
    %69 = arith.maximumf %67, %68 : vector<8x256xf32>
    %70 = vector.extract_strided_slice %69 {offsets = [0, 0], sizes = [8, 128], strides = [1, 1]} : vector<8x256xf32> to vector<8x128xf32>
    %71 = vector.extract_strided_slice %69 {offsets = [0, 128], sizes = [8, 128], strides = [1, 1]} : vector<8x256xf32> to vector<8x128xf32>
    %72 = arith.maximumf %70, %71 : vector<8x128xf32>
    %c0_51 = arith.constant 0 : index
    %c0_52 = arith.constant 0 : index
    %c0_53 = arith.constant 0 : index
    %73 = vector.load %arg7[%c0_51, %c0_52, %c0_53] : memref<2x4x8xf32, #tpu.memory_space<vmem>>, vector<1x4x8xf32>
    %74 = vector.shape_cast %73 : vector<1x4x8xf32> to vector<4x8xf32>
    %cst_54 = arith.constant dense<0.000000e+00> : vector<4x128xf32>
    %75 = tpu.matmul %74, %72, %cst_54 {dimension_numbers = #tpu.dot_dimension_numbers<[1], [0], [0], [1], [0, 0, 1, 1], [], []>} : vector<4x8xf32>, vector<8x128xf32>, vector<4x128xf32> -> vector<4x128xf32>
    %c1_55 = arith.constant 1 : index
    %c0_56 = arith.constant 0 : index
    %c0_57 = arith.constant 0 : index
    %76 = vector.load %arg7[%c1_55, %c0_56, %c0_57] : memref<2x4x8xf32, #tpu.memory_space<vmem>>, vector<1x4x8xf32>
    %77 = vector.shape_cast %76 : vector<1x4x8xf32> to vector<4x8xf32>
    %cst_58 = arith.constant dense<0.000000e+00> : vector<4x128xf32>
    %78 = tpu.matmul %77, %72, %cst_58 {dimension_numbers = #tpu.dot_dimension_numbers<[1], [0], [0], [1], [0, 0, 1, 1], [], []>} : vector<4x8xf32>, vector<8x128xf32>, vector<4x128xf32> -> vector<4x128xf32>
    %79 = arith.maximumf %75, %78 : vector<4x128xf32>
    %c0_59 = arith.constant 0 : index
    %c0_60 = arith.constant 0 : index
    %80 = vector.load %arg8[%c0_59, %c0_60] : memref<512x128xf32, #tpu.memory_space<vmem>>, vector<512x128xf32>
    %c0_61 = arith.constant 0 : index
    %c0_62 = arith.constant 0 : index
    %81 = vector.load %arg9[%c0_61, %c0_62] : memref<1x128xf32, #tpu.memory_space<vmem>>, vector<1x128xf32>
    %82 = vector.extract_strided_slice %79 {offsets = [0, 0], sizes = [1, 128], strides = [1, 1]} : vector<4x128xf32> to vector<1x128xf32>
    %83 = vector.extract_strided_slice %80 {offsets = [0, 0], sizes = [128, 128], strides = [1, 1]} : vector<512x128xf32> to vector<128x128xf32>
    %cst_63 = arith.constant dense<0.000000e+00> : vector<1x128xf32>
    %84 = tpu.matmul %82, %83, %cst_63 {dimension_numbers = #tpu.dot_dimension_numbers<[1], [0], [0], [1], [0, 0, 1, 1], [], []>} : vector<1x128xf32>, vector<128x128xf32>, vector<1x128xf32> -> vector<1x128xf32>
    %85 = arith.addf %81, %84 : vector<1x128xf32>
    %86 = vector.extract_strided_slice %79 {offsets = [1, 0], sizes = [1, 128], strides = [1, 1]} : vector<4x128xf32> to vector<1x128xf32>
    %87 = vector.extract_strided_slice %80 {offsets = [128, 0], sizes = [128, 128], strides = [1, 1]} : vector<512x128xf32> to vector<128x128xf32>
    %cst_64 = arith.constant dense<0.000000e+00> : vector<1x128xf32>
    %88 = tpu.matmul %86, %87, %cst_64 {dimension_numbers = #tpu.dot_dimension_numbers<[1], [0], [0], [1], [0, 0, 1, 1], [], []>} : vector<1x128xf32>, vector<128x128xf32>, vector<1x128xf32> -> vector<1x128xf32>
    %89 = arith.addf %85, %88 : vector<1x128xf32>
    %90 = vector.extract_strided_slice %79 {offsets = [2, 0], sizes = [1, 128], strides = [1, 1]} : vector<4x128xf32> to vector<1x128xf32>
    %91 = vector.extract_strided_slice %80 {offsets = [256, 0], sizes = [128, 128], strides = [1, 1]} : vector<512x128xf32> to vector<128x128xf32>
    %cst_65 = arith.constant dense<0.000000e+00> : vector<1x128xf32>
    %92 = tpu.matmul %90, %91, %cst_65 {dimension_numbers = #tpu.dot_dimension_numbers<[1], [0], [0], [1], [0, 0, 1, 1], [], []>} : vector<1x128xf32>, vector<128x128xf32>, vector<1x128xf32> -> vector<1x128xf32>
    %93 = arith.addf %89, %92 : vector<1x128xf32>
    %94 = vector.extract_strided_slice %79 {offsets = [3, 0], sizes = [1, 128], strides = [1, 1]} : vector<4x128xf32> to vector<1x128xf32>
    %95 = vector.extract_strided_slice %80 {offsets = [384, 0], sizes = [128, 128], strides = [1, 1]} : vector<512x128xf32> to vector<128x128xf32>
    %cst_66 = arith.constant dense<0.000000e+00> : vector<1x128xf32>
    %96 = tpu.matmul %94, %95, %cst_66 {dimension_numbers = #tpu.dot_dimension_numbers<[1], [0], [0], [1], [0, 0, 1, 1], [], []>} : vector<1x128xf32>, vector<128x128xf32>, vector<1x128xf32> -> vector<1x128xf32>
    %97 = arith.addf %93, %96 : vector<1x128xf32>
    %c0_67 = arith.constant 0 : index
    %c0_68 = arith.constant 0 : index
    %c0_69 = arith.constant 0 : index
    %98 = vector.load %arg10[%c0_67, %c0_68, %c0_69] : memref<1x1x128xf32, #tpu.memory_space<vmem>>, vector<1x1x128xf32>
    %99 = vector.shape_cast %98 : vector<1x1x128xf32> to vector<1x128xf32>
    %100 = vector.shape_cast %97 : vector<1x128xf32> to vector<1x1x128xf32>
    tpu.vector_store %arg10[%c0_67, %c0_68, %c0_69], %100 {strides = array<i32>} : memref<1x1x128xf32, #tpu.memory_space<vmem>>, vector<1x1x128xf32>,
    return
  }
  func.func @transform_0(%arg0: i32) -> (i32, i32, i32) {
    %c0_i32 = arith.constant 0 : i32
    %c0_i32_0 = arith.constant 0 : i32
    %c0_i32_1 = arith.constant 0 : i32
    return %arg0, %c0_i32, %c0_i32_0 : i32, i32, i32
  }
  func.func @transform_1(%arg0: i32) -> (i32, i32, i32) {
    %c0_i32 = arith.constant 0 : i32
    %c0_i32_0 = arith.constant 0 : i32
    %c0_i32_1 = arith.constant 0 : i32
    %c0_i32_2 = arith.constant 0 : i32
    return %c0_i32, %c0_i32_0, %c0_i32_1 : i32, i32, i32
  }
  func.func @transform_2(%arg0: i32) -> (i32, i32) {
    %c0_i32 = arith.constant 0 : i32
    %c0_i32_0 = arith.constant 0 : i32
    %c0_i32_1 = arith.constant 0 : i32
    return %c0_i32, %c0_i32_0 : i32, i32
  }
  func.func @transform_3(%arg0: i32) -> (i32, i32, i32) {
    %c0_i32 = arith.constant 0 : i32
    %c0_i32_0 = arith.constant 0 : i32
    %c0_i32_1 = arith.constant 0 : i32
    %c0_i32_2 = arith.constant 0 : i32
    return %c0_i32, %c0_i32_0, %c0_i32_1 : i32, i32, i32
  }
  func.func @transform_4(%arg0: i32) -> (i32, i32, i32) {
    %c0_i32 = arith.constant 0 : i32
    %c0_i32_0 = arith.constant 0 : i32
    %c0_i32_1 = arith.constant 0 : i32
    %c0_i32_2 = arith.constant 0 : i32
    return %c0_i32, %c0_i32_0, %c0_i32_1 : i32, i32, i32
  }
  func.func @transform_5(%arg0: i32) -> (i32, i32) {
    %c0_i32 = arith.constant 0 : i32
    %c0_i32_0 = arith.constant 0 : i32
    %c0_i32_1 = arith.constant 0 : i32
    return %c0_i32, %c0_i32_0 : i32, i32
  }
  func.func @transform_6(%arg0: i32) -> (i32, i32, i32) {
    %c0_i32 = arith.constant 0 : i32
    %c0_i32_0 = arith.constant 0 : i32
    %c0_i32_1 = arith.constant 0 : i32
    %c0_i32_2 = arith.constant 0 : i32
    return %c0_i32, %c0_i32_0, %c0_i32_1 : i32, i32, i32
  }
  func.func @transform_7(%arg0: i32) -> (i32, i32) {
    %c0_i32 = arith.constant 0 : i32
    %c0_i32_0 = arith.constant 0 : i32
    %c0_i32_1 = arith.constant 0 : i32
    return %c0_i32, %c0_i32_0 : i32, i32
  }
  func.func @transform_8(%arg0: i32) -> (i32, i32) {
    %c0_i32 = arith.constant 0 : i32
    %c0_i32_0 = arith.constant 0 : i32
    %c0_i32_1 = arith.constant 0 : i32
    return %c0_i32, %c0_i32_0 : i32, i32
  }
  func.func @transform_9(%arg0: i32) -> (i32, i32, i32) {
    %c0_i32 = arith.constant 0 : i32
    %c0_i32_0 = arith.constant 0 : i32
    %c0_i32_1 = arith.constant 0 : i32
    return %arg0, %c0_i32, %c0_i32_0 : i32, i32, i32
  }
}

</mosaic_0001>

<bundles_post_ra>
// kernel: tile.13
= control target key start
LH: loop header
LB: loop body
LE: loop exit
PB: predicated region body
PF: predicated region fallthrough
CT: control target
= control target key end

     0   :  { %s28_s0 = inlined_call_operand.vmem [shape: f32[10], index: 0, kind: input, shape index: {}]   ;;  %s29_s1 = inlined_call_operand.vmem [shape: f32[12,10], index: 1, kind: output, shape index: {}]  }
   0x1   :  { %v4_v0 = vld [vmem:[%s28_s0] ss:$0 sm:$0xff] }
   0x2   :  { %5 = vst [vmem:[%s29_s1] sm:$0xff] %v4_v0  ;;  %8 = vst [vmem:[%s29_s1 + $0x8] sm:$0xff] %v4_v0 }

// kernel: tile.14
= control target key start
LH: loop header
LB: loop body
LE: loop exit
PB: predicated region body
PF: predicated region fallthrough
CT: control target
= control target key end

     0   :  { %s101_s10 = smov 110   ;;  %s102_s11 = smov 90   ;;  %vm3_vm0 = vcmask 80896   ;;  %vm9_vm1 = vcmask 982896   ;;  %vm15_vm2 = vcmask 900896   ;;  %vm21_vm3 = vcmask 818896   ;;  %s161_s0 = inlined_call_operand.vmem [shape: f32[12,10], index: 0, kind: input, shape index: {}]   ;;  %s162_s1 = inlined_call_operand.vmem [shape: f32[120], index: 1, kind: output, shape index: {}]  }
   0x1   :  { %v79_v0 = vld [vmem:[%s161_s0 + $0xb] sm:$0x1]   ;;  %v81_v1 = vld [vmem:[%s161_s0 + $0x9] sm:$0x1]   ;;  %v80_v2 = vld [vmem:[%s161_s0 + $0xa] sm:$0x1]  }
   0x2   :  { %7 = vrot.lane.b32.xlu0 %v79_v0, %s101_s10  ;;  %19 = vrot.lane.b32.xlu1 %v81_v1, %s102_s11  ;;  %v82_v3 = vld [vmem:[%s161_s0 + $0x8] sm:$0x1]   ;;  %s103_s16 = smov 100   ;;  %s104_s17 = smov 80   ;;  %v83_v4 = vld [vmem:[%s161_s0 + $0x7] sm:$0x1]  }
   0x3   :  { %v2_v5 = vld [vmem:[%s161_s0] sm:$0x1]   ;;  %v84_v6 = vld [vmem:[%s161_s0 + $0x6] sm:$0x1]   ;;  %s105_s24 = smov 70   ;;  %s106_s25 = smov 60  }
   0x4   :  { %4 = vst.msk [vmem:[#allocation0] sm:$0x1] %vm3_vm0, %v2_v5   ;;  %v85_v7 = vld [vmem:[%s161_s0 + $0x5] sm:$0x1]   ;;  %v86_v8 = vld [vmem:[%s161_s0 + $0x4] sm:$0x1]  }
   0x5   :  { %s107_s30 = smov 50   ;;  %s108_s2 = smov 40   ;;  %v87_v9 = vld [vmem:[%s161_s0 + $0x3] sm:$0x1]   ;;  %v88_v10 = vld [vmem:[%s161_s0 + $0x2] sm:$0x1]  }
   0x6   :  { %13 = vrot.lane.b32.xlu0 %v80_v2, %s103_s16  ;;  %25 = vrot.lane.b32.xlu1 %v82_v3, %s104_s17  ;;  %s109_s7 = smov 30   ;;  %s110_s8 = smov 20   ;;  %v89_v11 = vld [vmem:[%s161_s0 + $0x1] sm:$0x1]   ;;  %vm27_vm4 = vcmask 736896   ;;  %vm33_vm5 = vcmask 654896  }
   0x7   :  { %s111_s0 = smov 10   ;;  %vm39_vm6 = vcmask 572896   ;;  %vm45_vm7 = vcmask 490896   ;;  %vm51_vm8 = vcmask 408896   ;;  %vm57_vm9 = vcmask 326896  }
   0x8   :  { %vm63_vm10 = vcmask 244896   ;;  %vm69_vm11 = vcmask 162896  }
   0xa   :  { %31 = vrot.lane.b32.xlu0 %v83_v4, %s105_s24  ;;  %37 = vrot.lane.b32.xlu1 %v84_v6, %s106_s25 }
   0xe   :  { %43 = vrot.lane.b32.xlu0 %v85_v7, %s107_s30  ;;  %49 = vrot.lane.b32.xlu1 %v86_v8, %s108_s2 }
  0x12   :  { %55 = vrot.lane.b32.xlu0 %v87_v9, %s109_s7  ;;  %61 = vrot.lane.b32.xlu1 %v88_v10, %s110_s8 }
  0x16   :  { %67 = vrot.lane.b32.xlu0 %v89_v11, %s111_s0 }
  0x74   :  { %v8_v12 = vpop.permute.xlu0 %7   ;;  %v20_v13 = vpop.permute.xlu1 %19  }
  0x75   :  { %10 = vst.msk [vmem:[#allocation0] sm:$0x1] %vm9_vm1, %v8_v12  }
  0x78   :  { %v14_v14 = vpop.permute.xlu0 %13   ;;  %v26_v15 = vpop.permute.xlu1 %25  }
  0x79   :  { %16 = vst.msk [vmem:[#allocation0] sm:$0x1] %vm15_vm2, %v14_v14  }
  0x7a   :  { %22 = vst.msk [vmem:[#allocation0] sm:$0x1] %vm21_vm3, %v20_v13  }
  0x7b   :  { %28 = vst.msk [vmem:[#allocation0] sm:$0x1] %vm27_vm4, %v26_v15  }
  0x7c   :  { %v32_v16 = vpop.permute.xlu0 %31   ;;  %v38_v17 = vpop.permute.xlu1 %37  }
  0x7d   :  { %34 = vst.msk [vmem:[#allocation0] sm:$0x1] %vm33_vm5, %v32_v16  }
  0x7e   :  { %40 = vst.msk [vmem:[#allocation0] sm:$0x1] %vm39_vm6, %v38_v17  }
  0x80   :  { %v44_v18 = vpop.permute.xlu0 %43   ;;  %v50_v19 = vpop.permute.xlu1 %49  }
  0x81   :  { %46 = vst.msk [vmem:[#allocation0] sm:$0x1] %vm45_vm7, %v44_v18  }
  0x82   :  { %52 = vst.msk [vmem:[#allocation0] sm:$0x1] %vm51_vm8, %v50_v19  }
  0x84   :  { %v56_v20 = vpop.permute.xlu0 %55   ;;  %v62_v21 = vpop.permute.xlu1 %61  }
  0x85   :  { %58 = vst.msk [vmem:[#allocation0] sm:$0x1] %vm57_vm9, %v56_v20  }
  0x86   :  { %64 = vst.msk [vmem:[#allocation0] sm:$0x1] %vm63_vm10, %v62_v21  }
  0x88   :  { %v68_v22 = vpop.permute.xlu0 %67  }
  0x89   :  { %70 = vst.msk [vmem:[#allocation0] sm:$0x1] %vm69_vm11, %v68_v22  }
  0x90   :  { %v75_v23 = vld [vmem:[#allocation0] sm:$0x1] }
  0x91   :  { %78 = vst [vmem:[%s162_s1] sm:$0x1] %v75_v23 }

// kernel: tile.18
= control target key start
LH: loop header
LB: loop body
LE: loop exit
PB: predicated region body
PF: predicated region fallthrough
CT: control target
= control target key end

     0   :  { %s22_s0 = inlined_call_operand.vmem [shape: f32[20], index: 0, kind: input, shape index: {}]   ;;  %s23_s1 = inlined_call_operand.vmem [shape: f32[4,20], index: 1, kind: output, shape index: {}]  }
   0x1   :  { %v4_v0 = vld [vmem:[%s22_s0] ss:$0 sm:$0xff] }
   0x2   :  { %5 = vst [vmem:[%s23_s1] sm:$0xf] %v4_v0 }

// kernel: tile.19
= control target key start
LH: loop header
LB: loop body
LE: loop exit
PB: predicated region body
PF: predicated region fallthrough
CT: control target
= control target key end

     0   :  { %vm8_vm0 = vcmask 162816   ;;  %s40_s8 = smov 20   ;;  %s41_s9 = smov 40   ;;  %vm14_vm1 = vcmask 654816   ;;  %vm20_vm2 = vcmask 490816   ;;  %vm26_vm3 = vcmask 326816   ;;  %s58_s0 = inlined_call_operand.vmem [shape: f32[4,20], index: 0, kind: input, shape index: {}]   ;;  %s59_s1 = inlined_call_operand.vmem [shape: f32[80], index: 1, kind: output, shape index: {}]  }
   0x1   :  { %v5_v0 = vld [vmem:[%s58_s0] sm:$0xf]  ;;  %s39_s0 = smov 60  }
   0x2   :  { %6 = vst [vmem:[#allocation1] sm:$0xf] %v5_v0 }
   0x9   :  { %v11_v1 = vld [vmem:[#allocation1 + $0x3] sm:$0x1]   ;;  %v23_v2 = vld [vmem:[#allocation1 + $0x1] sm:$0x1]   ;;  %v7_v3 = vld [vmem:[#allocation1] sm:$0x1]  }
   0xa   :  { %12 = vrot.lane.b32.xlu0 %v11_v1, %s39_s0  ;;  %24 = vrot.lane.b32.xlu1 %v23_v2, %s40_s8  ;;  %v17_v4 = vld [vmem:[#allocation1 + $0x2] sm:$0x1]   ;;  %9 = vst.msk [vmem:[#allocation0] sm:$0x1] %vm8_vm0, %v7_v3  }
   0xe   :  { %18 = vrot.lane.b32.xlu0 %v17_v4, %s41_s9 }
  0x7c   :  { %v13_v5 = vpop.permute.xlu0 %12   ;;  %v25_v6 = vpop.permute.xlu1 %24  }
  0x7d   :  { %15 = vst.msk [vmem:[#allocation0] sm:$0x1] %vm14_vm1, %v13_v5  }
  0x80   :  { %v19_v7 = vpop.permute.xlu0 %18  }
  0x81   :  { %21 = vst.msk [vmem:[#allocation0] sm:$0x1] %vm20_vm2, %v19_v7  }
  0x82   :  { %27 = vst.msk [vmem:[#allocation0] sm:$0x1] %vm26_vm3, %v25_v6  }
  0x89   :  { %v32_v8 = vld [vmem:[#allocation0] sm:$0x1] }
  0x8a   :  { %35 = vst [vmem:[%s59_s1] sm:$0x1] %v32_v8 }

// kernel: net_forward.1
= control target key start
LH: loop header
LB: loop body
LE: loop exit
PB: predicated region body
PF: predicated region fallthrough
CT: control target
= control target key end

     0   :  { %14 = vsyncpa [#allocation3], 0  ;;  %s3967_s0 = inlined_call_operand.vmem [shape: f32[2,28,28], index: 0, kind: input, shape index: {}]   ;;  %s3968_s1 = inlined_call_operand.vmem [shape: f32[5,28,256], index: 1, kind: input, shape index: {}]   ;;  %s3969_s2 = inlined_call_operand.vmem [shape: f32[1,256], index: 2, kind: input, shape index: {}]   ;;  %s3970_s3 = inlined_call_operand.vmem [shape: f32[2,12,24], index: 3, kind: input, shape index: {}]   ;;  %s3971_s4 = inlined_call_operand.vmem [shape: f32[5,128,256], index: 4, kind: input, shape index: {}]   ;;  %s3972_s5 = inlined_call_operand.vmem [shape: f32[1,256], index: 5, kind: input, shape index: {}]   ;;  %s3973_s6 = inlined_call_operand.vmem [shape: f32[2,4,8], index: 6, kind: input, shape index: {}]   ;;  %s3974_s7 = inlined_call_operand.vmem [shape: f32[512,128], index: 7, kind: input, shape index: {}]   ;;  %s3975_s8 = inlined_call_operand.vmem [shape: f32[1,128], index: 8, kind: input, shape index: {}]   ;;  %s3976_s9 = inlined_call_operand.hbm [shape: f32[2,1,128], index: 9, kind: output, shape index: {}]  }
   0x1   :  { %16 = vsyncpa [#allocation3 + $0x1], 0  ;;  %s2851_s30 = smov 0   ;;  %s2853_s10 = smov 0  }
   0x2   :  { %s2855_s11 = smov 0   ;;  %s2857_s12 = smov 0  }
   0x3 LB: > { %s2872_s13 = sadd.s32 4294967295, %s2796_s12   ;;  %s2241_s14 = sadd.s32 4294967294, %s2796_s12   ;;  %s2796_s12 = sphi %s2857_s12, %s3984_s12   ;;  %s2792_s11 = sphi %s2855_s11, %s3983_s11   ;;  %s2788_s10 = sphi %s2853_s10, %s3982_s10   ;;  %s2784_s30 = sphi %s2851_s30, %s3981_s30  }
   0x4   : > { %s2876_s15 = sadd.s32 1, %s2796_s12   ;;  %s223_s16 = sadd.s32 1, %s2792_s11 }
   0x5   : > { %s220_s17 = ssub.s32 %s2796_s12, %s2876_s15  ;;  %p233_p0 = scmp.ne.s32.totalorder %s2792_s11, %s2788_s10 }
   0x6   : > { %p221_p1 = scmp.eq.s32.totalorder %s220_s17, 0  ;;  %p234_p2 = scmp.eq.s32.totalorder %s2872_s13, 1 }
   0x7   : > { %p239_p3 = scmp.ne.s32.totalorder %s2788_s10, %s2784_s30  ;;  %p240_p4 = scmp.eq.s32.totalorder %s2241_s14, 1 }
   0x8   : > { %s2887_s18 = scalar_select %p221_p1, %s2792_s11, %s223_s16  }
   0x9   : > { %p2889_p5 = por %p234_p2, %p233_p0  ;;  %p2893_p6 = por %p240_p4, %p239_p3 }
   0xa   : > { %3977 = sst [smem:[#allocation5_spill]] %s2887_s18  ;;  %p2244_p7 = scmp.ge.s32.totalorder %s2796_s12, 1 }
   0xb   : > { %p290_p8 = scmp.lt.s32.totalorder %s2796_s12, 3 }
   0xd   : > { %p291_p9 = pnand %p2244_p7, %p290_p8 }
   0xe   : > { %p325_p10 = scmp.lt.s32.totalorder (!%p291_p9), %s2872_s13, 1  ;;  %s2441_s29 = sshll.u32 (!%p291_p9), %s2872_s13, 4 }
   0xf   : > { %294 = sbr.rel (%p291_p9) target bundleno = 1185 (0x4a1), region = 56 }
  0x14   : > { %v2254_v0 = vld [vmem:[%s3968_s1 + $0x78] sm:$0xf]  ;;  %vm370_vm0 = vcmask 1043456   ;;  %v2253_v1 = vld [vmem:[%s3968_s1 + $0x70] sm:$0xf]  ;;  %v2252_v2 = vld [vmem:[%s3968_s1 + $0x68] sm:$0xff] }
  0x15   : > { %2255 = vmatprep.subr.msk.mxu1 %vm370_vm0, %v2254_v0  ;;  %v2251_v3 = vld [vmem:[%s3968_s1 + $0x60] sm:$0xff]  ;;  %v2250_v4 = vld [vmem:[%s3968_s1 + $0x58] sm:$0xff]  ;;  %v2798_v5 = vmov 0.0   ;;  %v2249_v6 = vld [vmem:[%s3968_s1 + $0x50] sm:$0xff]  ;;  %s326_s21 = scalar_select %p325_p10, %s2872_s13, 1  ;;  %vm355_vm1 = vcmask 1046528  }
  0x16   : > { %2256 = vmatpush1.msk.msra.mxu1 %vm370_vm0, %v2253_v1  ;;  %441 = vmatprep.mubr.f32.mxu1 %v2798_v5  ;;  %v2272_v7 = vld [vmem:[%s3968_s1 + $0xb8] sm:$0xf]  ;;  %v2248_v8 = vld [vmem:[%s3968_s1 + $0x48] sm:$0xff]  ;;  %v2271_v9 = vld [vmem:[%s3968_s1 + $0xb0] sm:$0xf]  ;;  %vm363_vm2 = vcmask 228352  }
  0x17   : > { %403 = vmatprep.subr.mxu1 %v2252_v2  ;;  %648 = vmatprep.mubr.f32.mxu0 %v2798_v5  ;;  %v2270_v10 = vld [vmem:[%s3968_s1 + $0xa8] sm:$0xff]  ;;  %v2247_v11 = vld [vmem:[%s3968_s1 + $0x40] sm:$0xff]  ;;  %s2444_s17 = sshll.u32 %s326_s21, 5  ;;  %v2268_v13 = vld [vmem:[%s3968_s1 + $0x98] sm:$0xff]  ;;  %vm564_vm3 = vcmask 1045504   ;;  %vm682_vm4 = vcmask 1044480  }
  0x18   : > { %404 = vmatpush1.msra.mxu1 %v2251_v3  ;;  %2273 = vmatprep.subr.msk.mxu0 %vm370_vm0, %v2272_v7  ;;  %v2269_v12 = vld [vmem:[%s3968_s1 + $0xa0] sm:$0xff]  ;;  %s329_s28 = scalar_lea.vmem %s3967_s0, %s2444_s17  ;;  %v341_v14 = vld [vmem:[%s3968_s1 + $0x38] sm:$0xf]  ;;  %v2267_v15 = vld [vmem:[%s3968_s1 + $0x90] sm:$0xff]  ;;  %vm937_vm5 = vcmask 195584   ;;  %vm2799_vm6 = vmmov 0   ;;  %s3932_s17 = scalar_lea.hbm %s3976_s9, %s2441_s29 }
  0x19   : > { %405 = vmatprep.subr.mxu1 %v2250_v4  ;;  %2274 = vmatpush1.msk.msra.mxu0 %vm370_vm0, %v2271_v9  ;;  %v2955_v16 = vld [vmem:[%s329_s28] sm:$0xff]  ;;  %v2957_v17 = vld [vmem:[%s329_s28 + $0x8] sm:$0xff]  ;;  %v2959_v18 = vld [vmem:[%s329_s28 + $0x10] sm:$0xff]  ;;  %vm1666_vm7 = vcmask 64512   ;;  %s2800_s13 = smov [#allocation2]  }
  0x1a   : > { %406 = vmatpush1.msra.mxu1 %v2249_v6  ;;  %610 = vmatprep.subr.mxu0 %v2270_v10  ;;  %v356_v19 = vrot.slane %v2955_v16, 1  ;;  %v357_v20 = vrot.slane %v2957_v17, 1  ;;  %v359_v21 = vrot.slane %v2959_v18, 1  ;;  %v340_v22 = vld [vmem:[%s3968_s1 + $0x30] sm:$0xf]  ;;  %v2266_v23 = vld [vmem:[%s3968_s1 + $0x88] sm:$0xff] }
  0x1b   : > { %407 = vmatprep.subr.mxu1 %v2248_v8  ;;  %611 = vmatpush1.msra.mxu0 %v2269_v12  ;;  %v2971_v24 = vld [vmem:[%s329_s28 + $0x18] sm:$0xf]  ;;  %v2265_v25 = vld [vmem:[%s3968_s1 + $0x80] sm:$0xff]  ;;  %v565_v26 = vrot.slane %v2955_v16, 2  ;;  %v566_v27 = vrot.slane %v2957_v17, 2  ;;  %v339_v29 = vld [vmem:[%s3968_s1 + $0x28] sm:$0xff] }
  0x1c   : > { %408 = vmatpush1.msra.mxu1 %v2247_v11  ;;  %612 = vmatprep.subr.mxu0 %v2268_v13  ;;  %v358_v28 = vsel %vm355_vm1, %v356_v19, %v357_v20  ;;  %v568_v30 = vrot.slane %v2959_v18, 2  ;;  %v338_v31 = vld [vmem:[%s3968_s1 + $0x20] sm:$0xff]  ;;  %v360_v33 = vsel %vm355_vm1, %v357_v20, %v359_v21  ;;  %v361_v34 = vrot.slane %v2971_v24, 1  ;;  %v337_v35 = vld [vmem:[%s3968_s1 + $0x18] sm:$0xff]  ;;  %v336_v36 = vld [vmem:[%s3968_s1 + $0x10] sm:$0xff]  ;;  %s323_s28 = sand.u32 1, %s2788_s10  }
  0x1d   : > { %2260 = vmatprep.subr.msk.mxu1 %vm370_vm0, %v341_v14  ;;  %613 = vmatpush1.msra.mxu0 %v2267_v15  ;;  %v567_v32 = vsel %vm564_vm3, %v565_v26, %v566_v27  ;;  %v335_v37 = vld [vmem:[%s3968_s1 + $0x8] sm:$0xff]  ;;  %v334_v39 = vld [vmem:[%s3968_s1] sm:$0xff]  ;;  %v2298_v40 = vld [vmem:[%s3968_s1 + $0x138] sm:$0xf]  ;;  %v570_v43 = vrot.slane %v2971_v24, 2  ;;  %v800_v55 = vrot.slane %v2955_v16, 4 }
  0x1e   : > { %614 = vmatprep.subr.mxu0 %v2266_v23  ;;  %2257 = vmatmul.mubr.msk.f32.vlgmr.msra.gmra.mxu1 %vm363_vm2, %v358_v28  ;;  %v569_v38 = vsel %vm564_vm3, %v566_v27, %v568_v30  ;;  %v362_v41 = vsel %vm355_vm1, %v359_v21, %v361_v34  ;;  %v2285_v42 = vld [vmem:[%s3968_s1 + $0xf8] sm:$0xf]  ;;  %v2297_v44 = vld [vmem:[%s3968_s1 + $0x130] sm:$0xf]  ;;  %v2296_v45 = vld [vmem:[%s3968_s1 + $0x128] sm:$0xff]  ;;  %v801_v56 = vrot.slane %v2957_v17, 4 }
  0x1f   : > { %615 = vmatpush1.msra.mxu0 %v2265_v25  ;;  %447 = vmatprep.mubr.f32.mxu1 %v2798_v5  ;;  %v2295_v46 = vld [vmem:[%s3968_s1 + $0x120] sm:$0xff]  ;;  %v571_v47 = vsel %vm564_vm3, %v568_v30, %v570_v43  ;;  %v2284_v48 = vld [vmem:[%s3968_s1 + $0xf0] sm:$0xf]  ;;  %v2283_v49 = vld [vmem:[%s3968_s1 + $0xe8] sm:$0xff]  ;;  %v683_v61 = vrot.slane %v2955_v16, 3  ;;  %v684_v62 = vrot.slane %v2957_v17, 3 }
  0x20   : > { %2261 = vmatpush1.msk.msra.mxu1 %vm370_vm0, %v340_v22  ;;  %2275 = vmatmul.mubr.msk.f32.vlgmr.msra.gmra.mxu0 %vm363_vm2, %v567_v32  ;;  %v2294_v50 = vld [vmem:[%s3968_s1 + $0x118] sm:$0xff]  ;;  %v2282_v51 = vld [vmem:[%s3968_s1 + $0xe0] sm:$0xff]  ;;  %v2293_v52 = vld [vmem:[%s3968_s1 + $0x110] sm:$0xff]  ;;  %v802_v63 = vsel %vm370_vm0, %v800_v55, %v801_v56  ;;  %v803_v0 = vrot.slane %v2959_v18, 4  ;;  %v686_v2 = vrot.slane %v2959_v18, 3  ;;  %v805_v4 = vrot.slane %v2971_v24, 4 }
  0x21   : > { %498 = vmatprep.subr.mxu1 %v339_v29  ;;  %654 = vmatprep.mubr.f32.mxu0 %v2798_v5  ;;  %v2281_v53 = vld [vmem:[%s3968_s1 + $0xd8] sm:$0xff]  ;;  %v2280_v54 = vld [vmem:[%s3968_s1 + $0xd0] sm:$0xff]  ;;  %v2279_v57 = vld [vmem:[%s3968_s1 + $0xc8] sm:$0xff]  ;;  %v685_v1 = vsel %vm682_vm4, %v683_v61, %v684_v62  ;;  %v688_v7 = vrot.slane %v2971_v24, 3  ;;  %s324_s21 = scalar_lea.vmem [#allocation2], %s323_s28  ;;  %s2174_s22 = scalar_lea.sflag [#allocation3], %s323_s28 }
  0x22   : > { %499 = vmatpush1.msra.mxu1 %v338_v31  ;;  %2299 = vmatprep.subr.msk.mxu0 %vm370_vm0, %v2298_v40  ;;  %v2292_v58 = vld [vmem:[%s3968_s1 + $0x108] sm:$0xff]  ;;  %v2278_v59 = vld [vmem:[%s3968_s1 + $0xc0] sm:$0xff]  ;;  %v804_v3 = vsel %vm370_vm0, %v801_v56, %v803_v0  ;;  %v687_v6 = vsel %vm682_vm4, %v684_v62, %v686_v2  ;;  %v806_v8 = vsel %vm370_vm0, %v803_v0, %v805_v4  ;;  %v2341_v11 = vld [vmem:[%s3971_s4 + $0x1f8] sm:$0xff]  ;;  %s2186_s14 = sshll.u32 %s324_s21, 4  ;;  %s2740_s24 = sshll.u32 %s2800_s13, 4  ;;  %s2187_s14 = int_to_ptr.vmem [resolvable:$true] %s2186_s14  ;;  %s2741_s24 = int_to_ptr.vmem [resolvable:$false] %s2740_s24 }
  0x23   : > { %2258 = vmatmul.mubr.msk.f32.gmra.mxu1 %vm363_vm2, %v360_v33  ;;  %500 = vmatprep.subr.mxu1 %v337_v35  ;;  %v2291_v60 = vld [vmem:[%s3968_s1 + $0x100] sm:$0xff]  ;;  %v689_v9 = vsel %vm682_vm4, %v686_v2, %v688_v7  ;;  %v2340_v12 = vld [vmem:[%s3971_s4 + $0x1f0] sm:$0xff]  ;;  %v2339_v13 = vld [vmem:[%s3971_s4 + $0x1e8] sm:$0xff]  ;;  %s2736_s23 = scalar_lea.vmem %s2187_s14, 16  ;;  %s2742_s25 = scalar_lea.vmem %s2741_s24, 32 }
  0x24   : > { %453 = vmatprep.mubr.f32.mxu1 %v2798_v5  ;;  %501 = vmatpush1.msra.mxu1 %v336_v36  ;;  %v935_v10 = vld [vmem:[%s3970_s3] sm:$0xff]  ;;  %v2337_v15 = vld [vmem:[%s3971_s4 + $0x1d8] sm:$0xff]  ;;  %v2332_v20 = vld [vmem:[%s3971_s4 + $0x1b0] sm:$0xff]  ;;  %p2737_p11 = scmp.ne.s32.totalorder %s2187_s14, %s2736_s23  ;;  %p2743_p0 = scmp.lt.s32.totalorder %s2187_s14, %s2741_s24 }
  0x25   : > { %502 = vmatprep.subr.mxu1 %v335_v37  ;;  %2276 = vmatmul.mubr.msk.f32.gmra.mxu0 %vm363_vm2, %v569_v38  ;;  %v2338_v14 = vld [vmem:[%s3971_s4 + $0x1e0] sm:$0xff]  ;;  %v2333_v19 = vld [vmem:[%s3971_s4 + $0x1b8] sm:$0xff]  ;;  %v2331_v21 = vld [vmem:[%s3971_s4 + $0x1a8] sm:$0xff]  ;;  %p2744_p1 = scmp.lt.s32.totalorder %s2742_s25, %s2736_s23 }
  0x26   : > { %503 = vmatpush1.msra.mxu1 %v334_v39  ;;  %2300 = vmatpush1.msk.msra.mxu0 %vm370_vm0, %v2297_v44  ;;  %v2330_v22 = vld [vmem:[%s3971_s4 + $0x1a0] sm:$0xff]  ;;  %v2329_v23 = vld [vmem:[%s3971_s4 + $0x198] sm:$0xff]  ;;  %v2328_v24 = vld [vmem:[%s3971_s4 + $0x190] sm:$0xff]  ;;  %p2738_p12 = pnand %p2737_p11, %p2889_p5 }
  0x27   : > { %2259 = vmatmul.mubr.msk.f32.gmra.mxu1 %vm363_vm2, %v362_v41  ;;  %2286 = vmatprep.subr.msk.mxu1 %vm370_vm0, %v2285_v42  ;;  %v2327_v25 = vld [vmem:[%s3971_s4 + $0x188] sm:$0xff]  ;;  %v2326_v26 = vld [vmem:[%s3971_s4 + $0x180] sm:$0xff]  ;;  %v2325_v27 = vld [vmem:[%s3971_s4 + $0x178] sm:$0xff]  ;;  %p2745_p2 = por %p2744_p1, %p2743_p0 }
  0x28   : > { %536 = vmatprep.mubr.f32.mxu1 %v2798_v5  ;;  %845 = vmatprep.subr.mxu0 %v2296_v45  ;;  %v2324_v28 = vld [vmem:[%s3971_s4 + $0x170] sm:$0xff]  ;;  %v2323_v29 = vld [vmem:[%s3971_s4 + $0x168] sm:$0xff]  ;;  %v2322_v30 = vld [vmem:[%s3971_s4 + $0x160] sm:$0xff]  ;;  %p2739_p13 = pneg %p2738_p12 }
  0x29   : > { %660 = vmatprep.mubr.f32.mxu0 %v2798_v5  ;;  %846 = vmatpush1.msra.mxu0 %v2295_v46  ;;  %v2321_v31 = vld [vmem:[%s3971_s4 + $0x158] sm:$0xff] }
  0x2a   : > { %2277 = vmatmul.mubr.msk.f32.gmra.mxu0 %vm363_vm2, %v571_v47  ;;  %847 = vmatprep.subr.mxu0 %v2294_v50  ;;  %p2746_p3 = pnand %p2745_p2, %p2739_p13 }
  0x2b   : > { %2262 = vmatmul.mubr.msk.f32.vlgmr.msra.gmra.mxu1 %vm363_vm2, %v2955_v16  ;;  %848 = vmatpush1.msra.mxu0 %v2293_v52  ;;  %v2336_v16 = vld [vmem:[%s3971_s4 + $0x1d0] sm:$0xff] }
  0x2c   : > { %542 = vmatprep.mubr.f32.mxu1 %v2798_v5  ;;  %2287 = vmatpush1.msk.msra.mxu1 %vm370_vm0, %v2284_v48 }
  0x2d   : > { %728 = vmatprep.subr.mxu1 %v2283_v49  ;;  %849 = vmatprep.subr.mxu0 %v2292_v58 }
  0x2e   : > { %729 = vmatpush1.msra.mxu1 %v2282_v51  ;;  %850 = vmatpush1.msra.mxu0 %v2291_v60  ;;  %v910_v51 = vlaneseq }
  0x2f   : > { %2263 = vmatmul.mubr.msk.f32.gmra.mxu1 %vm363_vm2, %v2957_v17  ;;  %730 = vmatprep.subr.mxu1 %v2281_v53  ;;  %v2335_v17 = vld [vmem:[%s3971_s4 + $0x1c8] sm:$0xff] }
  0x30   : > { %548 = vmatprep.mubr.f32.mxu1 %v2798_v5  ;;  %731 = vmatpush1.msra.mxu1 %v2280_v54  ;;  %v3171_v60 = vshrl.u32 %v910_v51, 7  ;;  %v1133_v51 = vld [vmem:[%s3971_s4 + $0xe0] sm:$0xff] }
  0x31   : > { %732 = vmatprep.subr.mxu1 %v2279_v57  ;;  %883 = vmatprep.mubr.f32.mxu0 %v2798_v5 }
  0x32   : > { %733 = vmatpush1.msra.mxu1 %v2278_v59  ;;  %2301 = vmatmul.mubr.msk.f32.vlgmr.msra.gmra.mxu0 %vm363_vm2, %v802_v63  ;;  %v912_v7 = vsub.s32 0, %v3171_v60 }
  0x33   : > { %2264 = vmatmul.mubr.msk.f32.gmra.mxu1 %vm363_vm2, %v2959_v18  ;;  %889 = vmatprep.mubr.f32.mxu0 %v2798_v5  ;;  %v2334_v18 = vld [vmem:[%s3971_s4 + $0x1c0] sm:$0xff] }
  0x34   : > { %766 = vmatprep.mubr.f32.mxu1 %v2798_v5  ;;  %1176 = vmatprep.subr.mxu0 %v2341_v11 }
  0x35   : > { %1177 = vmatpush1.msra.mxu0 %v2340_v12  ;;  %v916_v12 = vsub.s32 1, %v3171_v60  ;;  %v1831_v60 = vld [vmem:[%s3974_s7 + $0x78] sm:$0xff] }
  0x36   : > { %2302 = vmatmul.mubr.msk.f32.gmra.mxu0 %vm363_vm2, %v804_v3  ;;  %1178 = vmatprep.subr.mxu0 %v2339_v13 }
  0x37   : > { %2288 = vmatmul.mubr.msk.f32.vlgmr.msra.gmra.mxu1 %vm363_vm2, %v685_v1  ;;  %895 = vmatprep.mubr.f32.mxu0 %v2798_v5 }
  0x38   : > { %772 = vmatprep.mubr.f32.mxu1 %v2798_v5  ;;  %1179 = vmatpush1.msra.mxu0 %v2338_v14 }
  0x39   : > { %1180 = vmatprep.subr.mxu0 %v2337_v15 }
  0x3a   : > { %2303 = vmatmul.mubr.msk.f32.gmra.mxu0 %vm363_vm2, %v806_v8 }
  0x3b   : > { %2289 = vmatmul.mubr.msk.f32.gmra.mxu1 %vm363_vm2, %v687_v6  ;;  %1240 = vmatprep.mubr.f32.mxu0 %v2798_v5 }
  0x3c   : > { %778 = vmatprep.mubr.f32.mxu1 %v2798_v5  ;;  %1181 = vmatpush1.msra.mxu0 %v2336_v16 }
  0x3d   : > { %1182 = vmatprep.subr.mxu0 %v2335_v17 }
  0x3e   : > { %1183 = vmatpush1.msra.mxu0 %v2334_v18 }
  0x3f   : > { %2290 = vmatmul.mubr.msk.f32.gmra.mxu1 %vm363_vm2, %v689_v9  ;;  %1184 = vmatprep.subr.mxu0 %v2333_v19 }
  0x40   : > { %2533 = vmatprep.mubr.msk.f32.mxu1 %vm937_vm5, %v935_v10  ;;  %1185 = vmatpush1.msra.mxu0 %v2332_v20  ;;  %v908_v10 = vld [vmem:[%s3969_s2] sm:$0x3] }
  0x41   : > { %1186 = vmatprep.subr.mxu0 %v2331_v21  ;;  %v913_v21 = vrot.slane %v908_v10, %v912_v7 }
  0x42   : > { %1187 = vmatpush1.msra.mxu0 %v2330_v22 }
  0x43   : > { %1188 = vmatprep.subr.mxu0 %v2329_v23 }
  0x44   : > { %1189 = vmatpush1.msra.mxu0 %v2328_v24  ;;  %v917_v24 = vrot.slane %v908_v10, %v916_v12  ;;  %v1113_v10 = vld [vmem:[%s3971_s4 + $0x40] sm:$0xff] }
  0x45   : > { %1190 = vmatprep.subr.mxu0 %v2327_v25 }
  0x46   : > { %1191 = vmatpush1.msra.mxu0 %v2326_v26 }
  0x47   : > { %1192 = vmatprep.subr.mxu0 %v2325_v27 }
  0x48   : > { %1193 = vmatpush1.msra.mxu0 %v2324_v28 }
  0x49   : > { %1194 = vmatprep.subr.mxu0 %v2323_v29 }
  0x4a   : > { %1195 = vmatpush1.msra.mxu0 %v2322_v30 }
  0x4b   : > { %1196 = vmatprep.subr.mxu0 %v2321_v31 }
  0xde   : > { %v443_v32 = vpop.f32.mrf.mxu1 }
  0xe0   : > { %v445_v33 = vpop.f32.mrf.mxu1  ;;  %v650_v34 = vpop.f32.mrf.mxu0 }
  0xe2   : > { %v652_v36 = vpop.f32.mrf.mxu0 }
  0xe3   : > { %v449_v35 = vpop.f32.mrf.mxu1 }
  0xe5   : > { %v451_v37 = vpop.f32.mrf.mxu1  ;;  %v656_v38 = vpop.f32.mrf.mxu0 }
  0xe7   : > { %v455_v39 = vpop.f32.mrf.mxu1  ;;  %v658_v40 = vpop.f32.mrf.mxu0 }
  0xe9   : > { %v457_v41 = vpop.f32.mrf.mxu1 }
  0xea   : > { %v662_v43 = vpop.f32.mrf.mxu0 }
  0xeb   : > { %v538_v42 = vpop.f32.mrf.mxu1 }
  0xec   : > { %v664_v46 = vpop.f32.mrf.mxu0  ;;  %v539_v61 = vadd.f32 %v538_v42, %v443_v32 }
  0xed   : > { %v540_v44 = vpop.f32.mrf.mxu1 }
  0xee   : > { %v541_v56 = vadd.f32 %v540_v44, %v445_v33  ;;  %v667_v9 = vadd.f32 %v650_v34, %v539_v61  ;;  %v1124_v61 = vld [vmem:[%s3971_s4 + $0x98] sm:$0xff] }
  0xef   : > { %v544_v45 = vpop.f32.mrf.mxu1 }
  0xf0   : > { %v545_v57 = vadd.f32 %v544_v45, %v449_v35  ;;  %v668_v1 = vadd.f32 %v652_v36, %v541_v56  ;;  %v936_v45 = vld [vmem:[%s3970_s3 + $0x8] sm:$0xf]  ;;  %v1128_v56 = vld [vmem:[%s3971_s4 + $0xb8] sm:$0xff] }
  0xf1   : > { %v546_v47 = vpop.f32.mrf.mxu1 }
  0xf2   : > { %v885_v49 = vpop.f32.mrf.mxu0  ;;  %v547_v54 = vadd.f32 %v546_v47, %v451_v37  ;;  %v669_v2 = vadd.f32 %v656_v38, %v545_v57  ;;  %v2307_v47 = vld [vmem:[%s3970_s3 + $0x18] sm:$0xf]  ;;  %v1127_v57 = vld [vmem:[%s3971_s4 + $0xb0] sm:$0xff] }
  0xf3   : > { %v550_v48 = vpop.f32.mrf.mxu1 }
  0xf4   : > { %v887_v52 = vpop.f32.mrf.mxu0  ;;  %v551_v59 = vadd.f32 %v550_v48, %v455_v39  ;;  %v670_v63 = vadd.f32 %v658_v40, %v547_v54  ;;  %v1136_v48 = vld [vmem:[%s3971_s4 + $0xf8] sm:$0xff]  ;;  %v1130_v54 = vld [vmem:[%s3971_s4 + $0xc8] sm:$0xff] }
  0xf5   : > { %v552_v50 = vpop.f32.mrf.mxu1 }
  0xf6   : > { %v891_v55 = vpop.f32.mrf.mxu0  ;;  %v553_v3 = vadd.f32 %v552_v50, %v457_v41  ;;  %v671_v6 = vadd.f32 %v662_v43, %v551_v59  ;;  %v1134_v50 = vld [vmem:[%s3971_s4 + $0xe8] sm:$0xff]  ;;  %v1125_v59 = vld [vmem:[%s3971_s4 + $0xa0] sm:$0xff] }
  0xf7   : > { %v768_v53 = vpop.f32.mrf.mxu1 }
  0xf8   : > { %v893_v0 = vpop.f32.mrf.mxu0  ;;  %v672_v17 = vadd.f32 %v664_v46, %v553_v3  ;;  %v785_v18 = vadd.f32 %v768_v53, %v667_v9  ;;  %v2306_v46 = vld [vmem:[%s3970_s3 + $0x10] sm:$0xff]  ;;  %v1118_v3 = vld [vmem:[%s3971_s4 + $0x68] sm:$0xff] }
  0xf9   : > { %v770_v58 = vpop.f32.mrf.mxu1  ;;  %v1131_v53 = vld [vmem:[%s3971_s4 + $0xd0] sm:$0xff]  ;;  %v1114_v9 = vld [vmem:[%s3971_s4 + $0x48] sm:$0xff] }
  0xfa   : > { %v786_v11 = vadd.f32 %v770_v58, %v668_v1  ;;  %v897_v16 = vpop.f32.mrf.mxu0  ;;  %v902_v28 = vadd.f32 %v885_v49, %v785_v18  ;;  %v1135_v49 = vld [vmem:[%s3971_s4 + $0xf0] sm:$0xff]  ;;  %v1126_v58 = vld [vmem:[%s3971_s4 + $0xa8] sm:$0xff]  ;;  %v1120_v1 = vld [vmem:[%s3971_s4 + $0x78] sm:$0xff] }
  0xfb   : > { %v774_v62 = vpop.f32.mrf.mxu1  ;;  %v2317_v18 = vld [vmem:[%s3971_s4 + $0x138] sm:$0xff] }
  0xfc   : > { %v787_v13 = vadd.f32 %v774_v62, %v669_v2  ;;  %v903_v23 = vadd.f32 %v887_v52, %v786_v11  ;;  %v899_v27 = vpop.f32.mrf.mxu0  ;;  %v920_v35 = vadd.f32 %v913_v21, %v902_v28  ;;  %v1132_v52 = vld [vmem:[%s3971_s4 + $0xd8] sm:$0xff]  ;;  %v1123_v62 = vld [vmem:[%s3971_s4 + $0x90] sm:$0xff] }
  0xfd   : > { %v776_v4 = vpop.f32.mrf.mxu1  ;;  %v1119_v2 = vld [vmem:[%s3971_s4 + $0x70] sm:$0xff] }
  0xfe   : > { %v788_v8 = vadd.f32 %v776_v4, %v670_v63  ;;  %v904_v25 = vadd.f32 %v891_v55, %v787_v13  ;;  %v921_v32 = vadd.f32 %v917_v24, %v903_v23  ;;  %v926_v42 = vmax.f32 %v920_v35, 0.0  ;;  %v1129_v55 = vld [vmem:[%s3971_s4 + $0xc0] sm:$0xff]  ;;  %v1122_v63 = vld [vmem:[%s3971_s4 + $0x88] sm:$0xff]  ;;  %v2320_v11 = vld [vmem:[%s3971_s4 + $0x150] sm:$0xff] }
  0xff   : > { %v780_v14 = vpop.f32.mrf.mxu1  ;;  %v1117_v4 = vld [vmem:[%s3971_s4 + $0x60] sm:$0xff]  ;;  %v1112_v13 = vld [vmem:[%s3971_s4 + $0x38] sm:$0xff]  ;;  %1197 = vmatpush1.msra.mxu0 %v2320_v11  ;;  %v1107_v23 = vld [vmem:[%s3971_s4 + $0x10] sm:$0xff] }
 0x100   : > { %v789_v15 = vadd.f32 %v780_v14, %v671_v6  ;;  %v905_v19 = vadd.f32 %v893_v0, %v788_v8  ;;  %v922_v33 = vadd.f32 %v913_v21, %v904_v25  ;;  %v927_v39 = vmax.f32 %v921_v32, 0.0  ;;  %v1121_v0 = vld [vmem:[%s3971_s4 + $0x80] sm:$0xff]  ;;  %v1116_v6 = vld [vmem:[%s3971_s4 + $0x58] sm:$0xff]  ;;  %v1115_v8 = vld [vmem:[%s3971_s4 + $0x50] sm:$0xff] }
 0x101   : > { %v782_v20 = vpop.f32.mrf.mxu1  ;;  %v2319_v14 = vld [vmem:[%s3971_s4 + $0x148] sm:$0xff]  ;;  %v2312_v28 = vld [vmem:[%s3971_s4 + $0x110] sm:$0xff]  ;;  %v2373_v32 = vld [vmem:[%s3971_s4 + $0x2f8] sm:$0xff] }
 0x102   : > { %v906_v22 = vadd.f32 %v897_v16, %v789_v15  ;;  %v790_v26 = vadd.f32 %v782_v20, %v672_v17  ;;  %v923_v29 = vadd.f32 %v917_v24, %v905_v19  ;;  %v928_v40 = vmax.f32 %v922_v33, 0.0  ;;  %v1111_v15 = vld [vmem:[%s3971_s4 + $0x30] sm:$0xff]  ;;  %1198 = vmatprep.subr.mxu0 %v2319_v14  ;;  %v2318_v16 = vld [vmem:[%s3971_s4 + $0x140] sm:$0xff]  ;;  %v1110_v17 = vld [vmem:[%s3971_s4 + $0x28] sm:$0xff] }
 0x103   : > { %v932_v44 = vmax.f32 %v926_v42, %v927_v39  ;;  %1199 = vmatpush1.msra.mxu0 %v2318_v16  ;;  %v1109_v19 = vld [vmem:[%s3971_s4 + $0x20] sm:$0xff]  ;;  %v2316_v20 = vld [vmem:[%s3971_s4 + $0x130] sm:$0xff]  ;;  %v1106_v25 = vld [vmem:[%s3971_s4 + $0x8] sm:$0xff] }
 0x104   : > { %v924_v30 = vadd.f32 %v913_v21, %v906_v22  ;;  %v907_v31 = vadd.f32 %v899_v27, %v790_v26  ;;  %v929_v36 = vmax.f32 %v923_v29, 0.0  ;;  %1200 = vmatprep.subr.mxu0 %v2317_v18  ;;  %v1108_v21 = vld [vmem:[%s3971_s4 + $0x18] sm:$0xff]  ;;  %v2315_v22 = vld [vmem:[%s3971_s4 + $0x128] sm:$0xff]  ;;  %v1105_v27 = vld [vmem:[%s3971_s4] sm:$0xff] }
 0x105   : > { %1201 = vmatpush1.msra.mxu0 %v2316_v20  ;;  %v2313_v26 = vld [vmem:[%s3971_s4 + $0x118] sm:$0xff]  ;;  %v2404_v39 = vld [vmem:[%s3971_s4 + $0x3f0] sm:$0xff]  ;;  %v2402_v42 = vld [vmem:[%s3971_s4 + $0x3e0] sm:$0xff] }
 0x106   : > { %v925_v34 = vadd.f32 %v917_v24, %v907_v31  ;;  %v930_v37 = vmax.f32 %v924_v30, 0.0  ;;  %v933_v43 = vmax.f32 %v928_v40, %v929_v36  ;;  %1202 = vmatprep.subr.mxu0 %v2315_v22  ;;  %v2314_v24 = vld [vmem:[%s3971_s4 + $0x120] sm:$0xff]  ;;  %v2405_v29 = vld [vmem:[%s3971_s4 + $0x3f8] sm:$0xff]  ;;  %v2311_v30 = vld [vmem:[%s3971_s4 + $0x108] sm:$0xff] }
 0x107   : > { %1203 = vmatpush1.msra.mxu0 %v2314_v24  ;;  %v2310_v31 = vld [vmem:[%s3971_s4 + $0x100] sm:$0xff]  ;;  %v2403_v40 = vld [vmem:[%s3971_s4 + $0x3e8] sm:$0xff]  ;;  %v2360_v11 = vld [vmem:[%s3971_s4 + $0x290] sm:$0xff] }
 0x108   : > { %v931_v38 = vmax.f32 %v925_v34, 0.0  ;;  %1204 = vmatprep.subr.mxu0 %v2313_v26  ;;  %v2359_v14 = vld [vmem:[%s3971_s4 + $0x288] sm:$0xff]  ;;  %v2358_v16 = vld [vmem:[%s3971_s4 + $0x280] sm:$0xff]  ;;  %v2357_v18 = vld [vmem:[%s3971_s4 + $0x278] sm:$0xff] }
 0x109   : > { %1205 = vmatpush1.msra.mxu0 %v2312_v28  ;;  %v2356_v20 = vld [vmem:[%s3971_s4 + $0x270] sm:$0xff]  ;;  %v2355_v22 = vld [vmem:[%s3971_s4 + $0x268] sm:$0xff]  ;;  %v2354_v24 = vld [vmem:[%s3971_s4 + $0x260] sm:$0xff] }
 0x10a   : > { %v934_v41 = vmax.f32 %v930_v37, %v931_v38  ;;  %1206 = vmatprep.subr.mxu0 %v2311_v30  ;;  %v2353_v26 = vld [vmem:[%s3971_s4 + $0x258] sm:$0xff]  ;;  %v2352_v28 = vld [vmem:[%s3971_s4 + $0x250] sm:$0xff]  ;;  %v2351_v30 = vld [vmem:[%s3971_s4 + $0x248] sm:$0xff] }
 0x10b   : > { %1207 = vmatpush1.msra.mxu0 %v2310_v31  ;;  %v2380_v31 = vld [vmem:[%s3971_s4 + $0x330] sm:$0xff] }
 0x10c   : > { %2527 = vmatprep.subr.mxu1 %v934_v41  ;;  %1355 = vmatprep.subr.mxu0 %v2373_v32  ;;  %v2350_v32 = vld [vmem:[%s3971_s4 + $0x240] sm:$0xff] }
 0x10d   : > { %2528 = vmatpush3.msra.mxu1 %v934_v41 }
 0x10e   : > { %2529 = vmatprep.subr.mxu1 %v933_v43 }
 0x10f   : > { %2530 = vmatpush3.msra.mxu1 %v933_v43 }
 0x110   : > { %2531 = vmatprep.subr.mxu1 %v932_v44 }
 0x111   : > { %2532 = vmatpush3.msra.mxu1 %v932_v44 }
 0x112   : > { %2536 = vmatprep.subr.mxu1 %v934_v41  ;;  %2534 = vmatmul.mubr.msk.f32.vlgmr.msra.gmra.mxu1 %vm937_vm5, %v936_v45 }
 0x113   : > { %2537 = vmatpush3.msra.mxu1 %v934_v41  ;;  %2542 = vmatprep.mubr.msk.f32.mxu1 %vm937_vm5, %v2306_v46  ;;  %v2372_v46 = vld [vmem:[%s3971_s4 + $0x2f0] sm:$0xff] }
 0x114   : > { %2538 = vmatprep.subr.mxu1 %v933_v43 }
 0x115   : > { %2539 = vmatpush3.msra.mxu1 %v933_v43 }
 0x116   : > { %2540 = vmatprep.subr.mxu1 %v932_v44 }
 0x117   : > { %2541 = vmatpush3.msra.mxu1 %v932_v44 }
 0x118   : > { %2543 = vmatmul.mubr.msk.f32.vlgmr.msra.gmra.mxu1 %vm937_vm5, %v2307_v47  ;;  %1247 = vmatprep.subr.mxu1 %v1136_v48  ;;  %v2401_v47 = vld [vmem:[%s3971_s4 + $0x3d8] sm:$0xff] }
 0x119   : > { %1248 = vmatpush1.msra.mxu1 %v1135_v49  ;;  %1311 = vmatprep.mubr.f32.mxu1 %v2798_v5  ;;  %v2371_v49 = vld [vmem:[%s3971_s4 + $0x2e8] sm:$0xff] }
 0x11a   : > { %1249 = vmatprep.subr.mxu1 %v1134_v50  ;;  %v2400_v50 = vld [vmem:[%s3971_s4 + $0x3d0] sm:$0xff] }
 0x11b   : > { %1250 = vmatpush1.msra.mxu1 %v1133_v51 }
 0x11c   : > { %1251 = vmatprep.subr.mxu1 %v1132_v52  ;;  %v2370_v52 = vld [vmem:[%s3971_s4 + $0x2e0] sm:$0xff] }
 0x11d   : > { %1252 = vmatpush1.msra.mxu1 %v1131_v53  ;;  %v2399_v53 = vld [vmem:[%s3971_s4 + $0x3c8] sm:$0xff] }
 0x11e   : > { %1253 = vmatprep.subr.mxu1 %v1130_v54  ;;  %v2369_v54 = vld [vmem:[%s3971_s4 + $0x2d8] sm:$0xff] }
 0x11f   : > { %1254 = vmatpush1.msra.mxu1 %v1129_v55  ;;  %v2398_v55 = vld [vmem:[%s3971_s4 + $0x3c0] sm:$0xff] }
 0x120   : > { %1255 = vmatprep.subr.mxu1 %v1128_v56  ;;  %v2368_v56 = vld [vmem:[%s3971_s4 + $0x2d0] sm:$0xff] }
 0x121   : > { %1256 = vmatpush1.msra.mxu1 %v1127_v57  ;;  %v2397_v57 = vld [vmem:[%s3971_s4 + $0x3b8] sm:$0xff] }
 0x122   : > { %1257 = vmatprep.subr.mxu1 %v1126_v58  ;;  %v2367_v58 = vld [vmem:[%s3971_s4 + $0x2c8] sm:$0xff] }
 0x123   : > { %1258 = vmatpush1.msra.mxu1 %v1125_v59  ;;  %v2396_v59 = vld [vmem:[%s3971_s4 + $0x3b0] sm:$0xff] }
 0x124   : > { %1259 = vmatprep.subr.mxu1 %v1124_v61  ;;  %v2366_v61 = vld [vmem:[%s3971_s4 + $0x2c0] sm:$0xff] }
 0x125   : > { %1260 = vmatpush1.msra.mxu1 %v1123_v62  ;;  %v2395_v62 = vld [vmem:[%s3971_s4 + $0x3a8] sm:$0xff] }
 0x126   : > { %1261 = vmatprep.subr.mxu1 %v1122_v63  ;;  %v2365_v63 = vld [vmem:[%s3971_s4 + $0x2b8] sm:$0xff] }
 0x127   : > { %1262 = vmatpush1.msra.mxu1 %v1121_v0  ;;  %v2394_v0 = vld [vmem:[%s3971_s4 + $0x3a0] sm:$0xff] }
 0x128   : > { %1263 = vmatprep.subr.mxu1 %v1120_v1  ;;  %v2364_v1 = vld [vmem:[%s3971_s4 + $0x2b0] sm:$0xff] }
 0x129   : > { %1264 = vmatpush1.msra.mxu1 %v1119_v2  ;;  %v2393_v2 = vld [vmem:[%s3971_s4 + $0x398] sm:$0xff] }
 0x12a   : > { %1265 = vmatprep.subr.mxu1 %v1118_v3  ;;  %v2363_v3 = vld [vmem:[%s3971_s4 + $0x2a8] sm:$0xff] }
 0x12b   : > { %1266 = vmatpush1.msra.mxu1 %v1117_v4  ;;  %v2392_v4 = vld [vmem:[%s3971_s4 + $0x390] sm:$0xff] }
 0x12c   : > { %1267 = vmatprep.subr.mxu1 %v1116_v6  ;;  %v2362_v6 = vld [vmem:[%s3971_s4 + $0x2a0] sm:$0xff] }
 0x12d   : > { %1268 = vmatpush1.msra.mxu1 %v1115_v8  ;;  %v2391_v8 = vld [vmem:[%s3971_s4 + $0x388] sm:$0xff] }
 0x12e   : > { %1269 = vmatprep.subr.mxu1 %v1114_v9  ;;  %v2361_v9 = vld [vmem:[%s3971_s4 + $0x298] sm:$0xff] }
 0x12f   : > { %1270 = vmatpush1.msra.mxu1 %v1113_v10  ;;  %v2390_v10 = vld [vmem:[%s3971_s4 + $0x380] sm:$0xff] }
 0x130   : > { %1271 = vmatprep.subr.mxu1 %v1112_v13  ;;  %v2389_v13 = vld [vmem:[%s3971_s4 + $0x378] sm:$0xff] }
 0x131   : > { %1272 = vmatpush1.msra.mxu1 %v1111_v15  ;;  %v2388_v15 = vld [vmem:[%s3971_s4 + $0x370] sm:$0xff] }
 0x132   : > { %1273 = vmatprep.subr.mxu1 %v1110_v17  ;;  %v2387_v17 = vld [vmem:[%s3971_s4 + $0x368] sm:$0xff] }
 0x133   : > { %1274 = vmatpush1.msra.mxu1 %v1109_v19  ;;  %v2386_v19 = vld [vmem:[%s3971_s4 + $0x360] sm:$0xff] }
 0x134   : > { %1275 = vmatprep.subr.mxu1 %v1108_v21  ;;  %v2385_v21 = vld [vmem:[%s3971_s4 + $0x358] sm:$0xff] }
 0x135   : > { %1276 = vmatpush1.msra.mxu1 %v1107_v23  ;;  %v2384_v23 = vld [vmem:[%s3971_s4 + $0x350] sm:$0xff] }
 0x136   : > { %1277 = vmatprep.subr.mxu1 %v1106_v25  ;;  %v2383_v25 = vld [vmem:[%s3971_s4 + $0x348] sm:$0xff] }
 0x137   : > { %1278 = vmatpush1.msra.mxu1 %v1105_v27  ;;  %v2382_v27 = vld [vmem:[%s3971_s4 + $0x340] sm:$0xff] }
 0x138   : > { %1465 = vmatprep.subr.mxu1 %v2405_v29  ;;  %v2381_v29 = vld [vmem:[%s3971_s4 + $0x338] sm:$0xff] }
 0x1d2   : > { %v2535_v33 = vpop.f32.mrf.mxu1 }
 0x1d4   : > { %v1010_v34 = vpop.f32.mrf.mxu1 }
 0x1d8   : > { %v2544_v35 = vpop.f32.mrf.mxu1 }
 0x1d9   : > { %v3330_v36 = vmax.f32 %v2535_v33, %v2544_v35  ;;  %v2379_v33 = vld [vmem:[%s3971_s4 + $0x328] sm:$0xff]  ;;  %v2378_v35 = vld [vmem:[%s3971_s4 + $0x320] sm:$0xff] }
 0x1da   : > { %v1094_v37 = vpop.f32.mrf.mxu1 }
 0x1db   : > { %v3332_v38 = vmax.f32 %v1010_v34, %v1094_v37  ;;  %v1173_v41 = vrot.slane %v3330_v36, 1  ;;  %v1572_v45 = vrot.slane %v3330_v36, 4  ;;  %v2349_v34 = vld [vmem:[%s3971_s4 + $0x238] sm:$0xff]  ;;  %v2348_v37 = vld [vmem:[%s3971_s4 + $0x230] sm:$0xff] }
 0x1dd   : > { %1312 = vmatmul.mubr.f32.vlgmr.msra.gmra.mxu1 %v3332_v38  ;;  %v1172_v43 = vrot.slane %v3332_v38, 1  ;;  %v1571_v44 = vrot.slane %v3332_v38, 4 }
 0x1de   : > { %1466 = vmatpush1.msra.mxu1 %v2404_v39  ;;  %1529 = vmatprep.mubr.f32.mxu1 %v2798_v5  ;;  %v2377_v39 = vld [vmem:[%s3971_s4 + $0x318] sm:$0xff] }
 0x1df   : > { %1467 = vmatprep.subr.mxu1 %v2403_v40  ;;  %v1174_v48 = vsel %vm355_vm1, %v1172_v43, %v1173_v41  ;;  %v3363_v51 = vsel %vm370_vm0, %v1571_v44, %v1572_v45  ;;  %v2347_v40 = vld [vmem:[%s3971_s4 + $0x228] sm:$0xff]  ;;  %v2376_v41 = vld [vmem:[%s3971_s4 + $0x310] sm:$0xff]  ;;  %v1461_v44 = vrot.slane %v3332_v38, 3  ;;  %v2345_v45 = vld [vmem:[%s3971_s4 + $0x218] sm:$0xff] }
 0x1e0   : > { %1468 = vmatpush1.msra.mxu1 %v2402_v42  ;;  %1241 = vmatmul.mubr.f32.vlgmr.msra.gmra.mxu0 %v1174_v48  ;;  %v2346_v42 = vld [vmem:[%s3971_s4 + $0x220] sm:$0xff]  ;;  %v2375_v43 = vld [vmem:[%s3971_s4 + $0x308] sm:$0xff]  ;;  %v1462_v48 = vrot.slane %v3330_v36, 3 }
 0x1e1   : > { %1356 = vmatpush1.msra.mxu0 %v2372_v46  ;;  %1469 = vmatprep.subr.mxu1 %v2401_v47  ;;  %v2374_v46 = vld [vmem:[%s3971_s4 + $0x300] sm:$0xff]  ;;  %v2344_v47 = vld [vmem:[%s3971_s4 + $0x210] sm:$0xff] }
 0x1e2   : > { %1357 = vmatprep.subr.mxu0 %v2371_v49  ;;  %1470 = vmatpush1.msra.mxu1 %v2400_v50  ;;  %v2343_v49 = vld [vmem:[%s3971_s4 + $0x208] sm:$0xff]  ;;  %v1351_v50 = vrot.slane %v3332_v38, 2  ;;  %v2436_v38 = vld [vmem:[%s3971_s4 + $0x4f0] sm:$0xff] }
 0x1e3   : > { %1358 = vmatpush1.msra.mxu0 %v2370_v52  ;;  %1471 = vmatprep.subr.mxu1 %v2399_v53  ;;  %v1463_v52 = vsel %vm682_vm4, %v1461_v44, %v1462_v48  ;;  %v2342_v53 = vld [vmem:[%s3971_s4 + $0x200] sm:$0xff] }
 0x1e4   : > { %1359 = vmatprep.subr.mxu0 %v2369_v54  ;;  %1472 = vmatpush1.msra.mxu1 %v2398_v55  ;;  %v1352_v54 = vrot.slane %v3330_v36, 2  ;;  %v2437_v55 = vld [vmem:[%s3971_s4 + $0x4f8] sm:$0xff]  ;;  %v2434_v36 = vld [vmem:[%s3971_s4 + $0x4e0] sm:$0xff] }
 0x1e5   : > { %1360 = vmatpush1.msra.mxu0 %v2368_v56  ;;  %1473 = vmatprep.subr.mxu1 %v2397_v57  ;;  %v2435_v57 = vld [vmem:[%s3971_s4 + $0x4e8] sm:$0xff] }
 0x1e6   : > { %1361 = vmatprep.subr.mxu0 %v2367_v58  ;;  %1474 = vmatpush1.msra.mxu1 %v2396_v59  ;;  %v1353_v56 = vsel %vm564_vm3, %v1351_v50, %v1352_v54  ;;  %v2433_v58 = vld [vmem:[%s3971_s4 + $0x4d8] sm:$0xff]  ;;  %v2432_v59 = vld [vmem:[%s3971_s4 + $0x4d0] sm:$0xff]  ;;  %v1665_v54 = vld [vmem:[%s3973_s6] sm:$0xf] }
 0x1e7   : > { %1362 = vmatpush1.msra.mxu0 %v2366_v61  ;;  %1475 = vmatprep.subr.mxu1 %v2395_v62  ;;  %v2431_v61 = vld [vmem:[%s3971_s4 + $0x4c8] sm:$0xff]  ;;  %v2430_v62 = vld [vmem:[%s3971_s4 + $0x4c0] sm:$0xff] }
 0x1e8   : > { %1363 = vmatprep.subr.mxu0 %v2365_v63  ;;  %1476 = vmatpush1.msra.mxu1 %v2394_v0  ;;  %v2429_v63 = vld [vmem:[%s3971_s4 + $0x4b8] sm:$0xff]  ;;  %v2428_v0 = vld [vmem:[%s3971_s4 + $0x4b0] sm:$0xff] }
 0x1e9   : > { %1364 = vmatpush1.msra.mxu0 %v2364_v1  ;;  %1477 = vmatprep.subr.mxu1 %v2393_v2  ;;  %v2427_v1 = vld [vmem:[%s3971_s4 + $0x4a8] sm:$0xff]  ;;  %v2426_v2 = vld [vmem:[%s3971_s4 + $0x4a0] sm:$0xff] }
 0x1ea   : > { %1365 = vmatprep.subr.mxu0 %v2363_v3  ;;  %1478 = vmatpush1.msra.mxu1 %v2392_v4  ;;  %v2425_v3 = vld [vmem:[%s3971_s4 + $0x498] sm:$0xff]  ;;  %v2424_v4 = vld [vmem:[%s3971_s4 + $0x490] sm:$0xff] }
 0x1eb   : > { %1366 = vmatpush1.msra.mxu0 %v2362_v6  ;;  %1479 = vmatprep.subr.mxu1 %v2391_v8  ;;  %v2423_v6 = vld [vmem:[%s3971_s4 + $0x488] sm:$0xff]  ;;  %v2422_v8 = vld [vmem:[%s3971_s4 + $0x480] sm:$0xff] }
 0x1ec   : > { %1367 = vmatprep.subr.mxu0 %v2361_v9  ;;  %1480 = vmatpush1.msra.mxu1 %v2390_v10  ;;  %v2421_v9 = vld [vmem:[%s3971_s4 + $0x478] sm:$0xff]  ;;  %v2420_v10 = vld [vmem:[%s3971_s4 + $0x470] sm:$0xff] }
 0x1ed   : > { %1368 = vmatpush1.msra.mxu0 %v2360_v11  ;;  %1481 = vmatprep.subr.mxu1 %v2389_v13  ;;  %v2419_v11 = vld [vmem:[%s3971_s4 + $0x468] sm:$0xff]  ;;  %v2418_v13 = vld [vmem:[%s3971_s4 + $0x460] sm:$0xff] }
 0x1ee   : > { %1369 = vmatprep.subr.mxu0 %v2359_v14  ;;  %1482 = vmatpush1.msra.mxu1 %v2388_v15  ;;  %v2417_v14 = vld [vmem:[%s3971_s4 + $0x458] sm:$0xff]  ;;  %v2416_v15 = vld [vmem:[%s3971_s4 + $0x450] sm:$0xff] }
 0x1ef   : > { %1370 = vmatpush1.msra.mxu0 %v2358_v16  ;;  %1483 = vmatprep.subr.mxu1 %v2387_v17  ;;  %v2415_v16 = vld [vmem:[%s3971_s4 + $0x448] sm:$0xff]  ;;  %v2414_v17 = vld [vmem:[%s3971_s4 + $0x440] sm:$0xff] }
 0x1f0   : > { %1371 = vmatprep.subr.mxu0 %v2357_v18  ;;  %1484 = vmatpush1.msra.mxu1 %v2386_v19  ;;  %v2413_v18 = vld [vmem:[%s3971_s4 + $0x438] sm:$0xff]  ;;  %v2412_v19 = vld [vmem:[%s3971_s4 + $0x430] sm:$0xff] }
 0x1f1   : > { %1372 = vmatpush1.msra.mxu0 %v2356_v20  ;;  %1485 = vmatprep.subr.mxu1 %v2385_v21  ;;  %v2411_v20 = vld [vmem:[%s3971_s4 + $0x428] sm:$0xff]  ;;  %v2410_v21 = vld [vmem:[%s3971_s4 + $0x420] sm:$0xff] }
 0x1f2   : > { %1373 = vmatprep.subr.mxu0 %v2355_v22  ;;  %1486 = vmatpush1.msra.mxu1 %v2384_v23  ;;  %v2409_v22 = vld [vmem:[%s3971_s4 + $0x418] sm:$0xff]  ;;  %v2408_v23 = vld [vmem:[%s3971_s4 + $0x410] sm:$0xff] }
 0x1f3   : > { %1374 = vmatpush1.msra.mxu0 %v2354_v24  ;;  %1487 = vmatprep.subr.mxu1 %v2383_v25  ;;  %v2407_v24 = vld [vmem:[%s3971_s4 + $0x408] sm:$0xff]  ;;  %v2406_v25 = vld [vmem:[%s3971_s4 + $0x400] sm:$0xff] }
 0x1f4   : > { %1375 = vmatprep.subr.mxu0 %v2353_v26  ;;  %1488 = vmatpush1.msra.mxu1 %v2382_v27 }
 0x1f5   : > { %1376 = vmatpush1.msra.mxu0 %v2352_v28  ;;  %1489 = vmatprep.subr.mxu1 %v2381_v29 }
 0x1f6   : > { %1377 = vmatprep.subr.mxu0 %v2351_v30  ;;  %1490 = vmatpush1.msra.mxu1 %v2380_v31 }
 0x1f7   : > { %1378 = vmatpush1.msra.mxu0 %v2350_v32  ;;  %1491 = vmatprep.subr.mxu1 %v2379_v33 }
 0x1f8   : > { %1379 = vmatprep.subr.mxu0 %v2349_v34  ;;  %1492 = vmatpush1.msra.mxu1 %v2378_v35 }
 0x1f9   : > { %1380 = vmatpush1.msra.mxu0 %v2348_v37  ;;  %1493 = vmatprep.subr.mxu1 %v2377_v39 }
 0x1fa   : > { %1381 = vmatprep.subr.mxu0 %v2347_v40  ;;  %1494 = vmatpush1.msra.mxu1 %v2376_v41 }
 0x1fb   : > { %1382 = vmatpush1.msra.mxu0 %v2346_v42  ;;  %1495 = vmatprep.subr.mxu1 %v2375_v43 }
 0x1fc   : > { %1383 = vmatprep.subr.mxu0 %v2345_v45  ;;  %1496 = vmatpush1.msra.mxu1 %v2374_v46 }
 0x1fd   : > { %1384 = vmatpush1.msra.mxu0 %v2344_v47  ;;  %1530 = vmatmul.mubr.f32.vlgmr.msra.gmra.mxu1 %v1463_v52 }
 0x1fe   : > { %1385 = vmatprep.subr.mxu0 %v2343_v49  ;;  %1419 = vmatprep.mubr.f32.mxu0 %v2798_v5 }
 0x1ff   : > { %1386 = vmatpush1.msra.mxu0 %v2342_v53  ;;  %2550 = vmatprep.subr.mxu1 %v2798_v5 }
 0x200   : > { %1420 = vmatmul.mubr.f32.vlgmr.msra.gmra.mxu0 %v1353_v56  ;;  %1575 = vmatprep.subr.mxu0 %v2437_v55  ;;  %v1830_v55 = vld [vmem:[%s3974_s7 + $0x70] sm:$0xff]  ;;  %v1829_v56 = vld [vmem:[%s3974_s7 + $0x68] sm:$0xff] }
 0x201   : > { %1576 = vmatpush1.msra.mxu0 %v2436_v38  ;;  %1639 = vmatprep.mubr.f32.mxu0 %v2798_v5  ;;  %v1846_v38 = vld [vmem:[%s3974_s7 + $0xf0] sm:$0xff] }
 0x202   : > { %1577 = vmatprep.subr.mxu0 %v2435_v57  ;;  %2552 = vmatprep.mubr.msk.f32.mxu1 %vm2799_vm6, %v2798_v5  ;;  %v1845_v57 = vld [vmem:[%s3974_s7 + $0xe8] sm:$0xff] }
 0x203   : > { %1578 = vmatpush1.msra.mxu0 %v2434_v36  ;;  %v1828_v36 = vld [vmem:[%s3974_s7 + $0x60] sm:$0xff] }
 0x204   : > { %1579 = vmatprep.subr.mxu0 %v2433_v58  ;;  %v1844_v58 = vld [vmem:[%s3974_s7 + $0xe0] sm:$0xff] }
 0x205   : > { %1580 = vmatpush1.msra.mxu0 %v2432_v59  ;;  %v1827_v59 = vld [vmem:[%s3974_s7 + $0x58] sm:$0xff] }
 0x206   : > { %1581 = vmatprep.subr.mxu0 %v2431_v61  ;;  %v1843_v61 = vld [vmem:[%s3974_s7 + $0xd8] sm:$0xff] }
 0x207   : > { %1582 = vmatpush1.msra.mxu0 %v2430_v62  ;;  %v1826_v62 = vld [vmem:[%s3974_s7 + $0x50] sm:$0xff] }
 0x208   : > { %1583 = vmatprep.subr.mxu0 %v2429_v63  ;;  %v1842_v63 = vld [vmem:[%s3974_s7 + $0xd0] sm:$0xff] }
 0x209   : > { %1584 = vmatpush1.msra.mxu0 %v2428_v0  ;;  %v1825_v0 = vld [vmem:[%s3974_s7 + $0x48] sm:$0xff] }
 0x20a   : > { %1585 = vmatprep.subr.mxu0 %v2427_v1  ;;  %v1841_v1 = vld [vmem:[%s3974_s7 + $0xc8] sm:$0xff] }
 0x20b   : > { %1586 = vmatpush1.msra.mxu0 %v2426_v2  ;;  %v1824_v2 = vld [vmem:[%s3974_s7 + $0x40] sm:$0xff] }
 0x20c   : > { %1587 = vmatprep.subr.mxu0 %v2425_v3  ;;  %v1840_v3 = vld [vmem:[%s3974_s7 + $0xc0] sm:$0xff] }
 0x20d   : > { %1588 = vmatpush1.msra.mxu0 %v2424_v4  ;;  %v1823_v4 = vld [vmem:[%s3974_s7 + $0x38] sm:$0xff] }
 0x20e   : > { %1589 = vmatprep.subr.mxu0 %v2423_v6  ;;  %v1839_v6 = vld [vmem:[%s3974_s7 + $0xb8] sm:$0xff] }
 0x20f   : > { %1590 = vmatpush1.msra.mxu0 %v2422_v8  ;;  %v1822_v8 = vld [vmem:[%s3974_s7 + $0x30] sm:$0xff] }
 0x210   : > { %1591 = vmatprep.subr.mxu0 %v2421_v9  ;;  %v1838_v9 = vld [vmem:[%s3974_s7 + $0xb0] sm:$0xff] }
 0x211   : > { %1592 = vmatpush1.msra.mxu0 %v2420_v10  ;;  %v1821_v10 = vld [vmem:[%s3974_s7 + $0x28] sm:$0xff] }
 0x212   : > { %1593 = vmatprep.subr.mxu0 %v2419_v11  ;;  %v1837_v11 = vld [vmem:[%s3974_s7 + $0xa8] sm:$0xff] }
 0x213   : > { %1594 = vmatpush1.msra.mxu0 %v2418_v13  ;;  %v1820_v13 = vld [vmem:[%s3974_s7 + $0x20] sm:$0xff] }
 0x214   : > { %1595 = vmatprep.subr.mxu0 %v2417_v14  ;;  %v1836_v14 = vld [vmem:[%s3974_s7 + $0xa0] sm:$0xff] }
 0x215   : > { %1596 = vmatpush1.msra.mxu0 %v2416_v15  ;;  %v1819_v15 = vld [vmem:[%s3974_s7 + $0x18] sm:$0xff] }
 0x216   : > { %1597 = vmatprep.subr.mxu0 %v2415_v16  ;;  %v1835_v16 = vld [vmem:[%s3974_s7 + $0x98] sm:$0xff] }
 0x217   : > { %1598 = vmatpush1.msra.mxu0 %v2414_v17  ;;  %v1818_v17 = vld [vmem:[%s3974_s7 + $0x10] sm:$0xff] }
 0x218   : > { %1599 = vmatprep.subr.mxu0 %v2413_v18  ;;  %v1834_v18 = vld [vmem:[%s3974_s7 + $0x90] sm:$0xff] }
 0x219   : > { %1600 = vmatpush1.msra.mxu0 %v2412_v19  ;;  %v1817_v19 = vld [vmem:[%s3974_s7 + $0x8] sm:$0xff] }
 0x21a   : > { %1601 = vmatprep.subr.mxu0 %v2411_v20  ;;  %v1816_v20 = vld [vmem:[%s3974_s7] sm:$0xff] }
 0x21b   : > { %1602 = vmatpush1.msra.mxu0 %v2410_v21  ;;  %v1833_v21 = vld [vmem:[%s3974_s7 + $0x88] sm:$0xff] }
 0x21c   : > { %1603 = vmatprep.subr.mxu0 %v2409_v22  ;;  %v1832_v22 = vld [vmem:[%s3974_s7 + $0x80] sm:$0xff] }
 0x21d   : > { %1604 = vmatpush1.msra.mxu0 %v2408_v23 }
 0x21e   : > { %1605 = vmatprep.subr.mxu0 %v2407_v24 }
 0x21f   : > { %1606 = vmatpush1.msra.mxu0 %v2406_v25 }
 0x220   : > { %1640 = vmatmul.mubr.f32.vlgmr.msra.gmra.mxu0 %v3363_v51  ;;  %2545 = vmatprep.subr.mxu0 %v2798_v5  ;;  %v1648_v51 = vld [vmem:[%s3972_s5] sm:$0x3] }
 0x221   : > { %2547 = vmatprep.mubr.msk.f32.mxu0 %vm2799_vm6, %v2798_v5  ;;  %v1653_v40 = vrot.slane %v1648_v51, %v912_v7  ;;  %v1657_v45 = vrot.slane %v1648_v51, %v916_v12  ;;  %v2439_v7 = vld [vmem:[%s3973_s6 + $0x4] sm:$0xf]  ;;  %v1847_v12 = vld [vmem:[%s3974_s7 + $0xf8] sm:$0xff] }
 0x222   : > { %v1859_v51 = vld [vmem:[%s3974_s7 + $0x158] sm:$0xff] }
 0x29d   : > { %v1313_v28 = vpop.f32.mrf.mxu1 }
 0x29f   : > { %v1315_v31 = vpop.f32.mrf.mxu1 }
 0x2a0   : > { %v1242_v26 = vpop.f32.mrf.mxu0 }
 0x2a1   : > { %v1314_v30 = vadd.f32 %v1313_v28, %v1242_v26  ;;  %v1863_v26 = vld [vmem:[%s3974_s7 + $0x178] sm:$0xff] }
 0x2a2   : > { %v1244_v27 = vpop.f32.mrf.mxu0 }
 0x2a3   : > { %v1316_v33 = vadd.f32 %v1315_v31, %v1244_v27  ;;  %v1879_v31 = vld [vmem:[%s3974_s7 + $0x1f8] sm:$0xff] }
 0x2bd   : > { %v1531_v35 = vpop.f32.mrf.mxu1 }
 0x2bf   : > { %v1533_v41 = vpop.f32.mrf.mxu1 }
 0x2c0   : > { %v1421_v29 = vpop.f32.mrf.mxu0 }
 0x2c1   : > { %v1426_v34 = vadd.f32 %v1421_v29, %v1314_v30  ;;  %v1862_v30 = vld [vmem:[%s3974_s7 + $0x170] sm:$0xff] }
 0x2c2   : > { %v1423_v32 = vpop.f32.mrf.mxu0 }
 0x2c3   : > { %v1427_v37 = vadd.f32 %v1423_v32, %v1316_v33  ;;  %v1536_v39 = vadd.f32 %v1531_v35, %v1426_v34  ;;  %v1861_v32 = vld [vmem:[%s3974_s7 + $0x168] sm:$0xff]  ;;  %v1878_v33 = vld [vmem:[%s3974_s7 + $0x1f0] sm:$0xff]  ;;  %v1860_v34 = vld [vmem:[%s3974_s7 + $0x160] sm:$0xff] }
 0x2c4   : > { %v1877_v35 = vld [vmem:[%s3974_s7 + $0x1e8] sm:$0xff] }
 0x2c5   : > { %v1537_v44 = vadd.f32 %v1533_v41, %v1427_v37  ;;  %v1876_v37 = vld [vmem:[%s3974_s7 + $0x1e0] sm:$0xff]  ;;  %v1857_v41 = vld [vmem:[%s3974_s7 + $0x148] sm:$0xff] }
 0x2e0   : > { %v1641_v42 = vpop.f32.mrf.mxu0 }
 0x2e1   : > { %v1646_v43 = vadd.f32 %v1641_v42, %v1536_v39  ;;  %v1858_v39 = vld [vmem:[%s3974_s7 + $0x150] sm:$0xff] }
 0x2e2   : > { %v1643_v46 = vpop.f32.mrf.mxu0  ;;  %v1874_v42 = vld [vmem:[%s3974_s7 + $0x1d0] sm:$0xff] }
 0x2e3   : > { %v1660_v47 = vadd.f32 %v1653_v40, %v1646_v43  ;;  %v1647_v48 = vadd.f32 %v1643_v46, %v1537_v44  ;;  %v1875_v40 = vld [vmem:[%s3974_s7 + $0x1d8] sm:$0xff]  ;;  %v1856_v43 = vld [vmem:[%s3974_s7 + $0x140] sm:$0xff]  ;;  %v1873_v44 = vld [vmem:[%s3974_s7 + $0x1c8] sm:$0xff] }
 0x2e4   : > { %v1872_v46 = vld [vmem:[%s3974_s7 + $0x1c0] sm:$0xff] }
 0x2e5   : > { %v1661_v49 = vadd.f32 %v1657_v45, %v1647_v48  ;;  %v1662_v50 = vmax.f32 %v1660_v47, 0.0  ;;  %v1855_v45 = vld [vmem:[%s3974_s7 + $0x138] sm:$0xff]  ;;  %v1854_v47 = vld [vmem:[%s3974_s7 + $0x130] sm:$0xff] }
 0x2e6   : > { %v1871_v48 = vld [vmem:[%s3974_s7 + $0x1b8] sm:$0xff] }
 0x2e7   : > { %v1663_v52 = vmax.f32 %v1661_v49, 0.0  ;;  %v1853_v49 = vld [vmem:[%s3974_s7 + $0x128] sm:$0xff] }
 0x2e9   : > { %v1664_v53 = vmax.f32 %v1662_v50, %v1663_v52  ;;  %v1870_v50 = vld [vmem:[%s3974_s7 + $0x1b0] sm:$0xff]  ;;  %v1852_v52 = vld [vmem:[%s3974_s7 + $0x120] sm:$0xff] }
 0x2eb   : > { %2546 = vmatpush3.msra.mxu0 %v1664_v53  ;;  %2551 = vmatpush3.msra.mxu1 %v1664_v53  ;;  %v1869_v53 = vld [vmem:[%s3974_s7 + $0x1a8] sm:$0xff] }
 0x2ec   : > { %2548 = vmatmul.mubr.msk.f32.vlgmr.msra.gmra.mxu0 %vm1666_vm7, %v1665_v54  ;;  %2553 = vmatmul.mubr.msk.f32.vlgmr.msra.gmra.mxu1 %vm1666_vm7, %v2439_v7  ;;  %v1851_v54 = vld [vmem:[%s3974_s7 + $0x118] sm:$0xff]  ;;  %v1868_v7 = vld [vmem:[%s3974_s7 + $0x1a0] sm:$0xff] }
 0x2ed   : > { %2555 = vmatprep.subr.mxu1 %v2798_v5  ;;  %2590 = vmatprep.subr.mxu0 %v2798_v5 }
 0x2ee   : > { %2556 = vmatpush3.msra.mxu1 %v1831_v60  ;;  %2591 = vmatpush3.msra.mxu0 %v1847_v12  ;;  %v1850_v60 = vld [vmem:[%s3974_s7 + $0x110] sm:$0xff]  ;;  %v1867_v12 = vld [vmem:[%s3974_s7 + $0x198] sm:$0xff] }
 0x2ef   : > { %2557 = vmatprep.subr.mxu1 %v2798_v5  ;;  %2592 = vmatprep.subr.mxu0 %v2798_v5 }
 0x2f0   : > { %2558 = vmatpush3.msra.mxu1 %v1830_v55  ;;  %2593 = vmatpush3.msra.mxu0 %v1846_v38  ;;  %v1849_v55 = vld [vmem:[%s3974_s7 + $0x108] sm:$0xff]  ;;  %v1866_v38 = vld [vmem:[%s3974_s7 + $0x190] sm:$0xff] }
 0x2f1   : > { %2559 = vmatprep.subr.mxu1 %v2798_v5  ;;  %2594 = vmatprep.subr.mxu0 %v2798_v5 }
 0x2f2   : > { %2560 = vmatpush3.msra.mxu1 %v1829_v56  ;;  %2595 = vmatpush3.msra.mxu0 %v1845_v57  ;;  %v1848_v56 = vld [vmem:[%s3974_s7 + $0x100] sm:$0xff]  ;;  %v1865_v57 = vld [vmem:[%s3974_s7 + $0x188] sm:$0xff] }
 0x2f3   : > { %2561 = vmatprep.subr.mxu1 %v2798_v5  ;;  %2596 = vmatprep.subr.mxu0 %v2798_v5 }
 0x2f4   : > { %2562 = vmatpush3.msra.mxu1 %v1828_v36  ;;  %2597 = vmatpush3.msra.mxu0 %v1844_v58  ;;  %v1864_v58 = vld [vmem:[%s3974_s7 + $0x180] sm:$0xff] }
 0x2f5   : > { %2563 = vmatprep.subr.mxu1 %v2798_v5  ;;  %2598 = vmatprep.subr.mxu0 %v2798_v5 }
 0x2f6   : > { %2564 = vmatpush3.msra.mxu1 %v1827_v59  ;;  %2599 = vmatpush3.msra.mxu0 %v1843_v61 }
 0x2f7   : > { %2565 = vmatprep.subr.mxu1 %v2798_v5  ;;  %2600 = vmatprep.subr.mxu0 %v2798_v5 }
 0x2f8   : > { %2566 = vmatpush3.msra.mxu1 %v1826_v62  ;;  %2601 = vmatpush3.msra.mxu0 %v1842_v63 }
 0x2f9   : > { %2567 = vmatprep.subr.mxu1 %v2798_v5  ;;  %2602 = vmatprep.subr.mxu0 %v2798_v5 }
 0x2fa   : > { %2568 = vmatpush3.msra.mxu1 %v1825_v0  ;;  %2603 = vmatpush3.msra.mxu0 %v1841_v1  ;;  %v1880_v1 = vld [vmem:[%s3975_s8] sm:$0x1] }
 0x2fb   : > { %2569 = vmatprep.subr.mxu1 %v2798_v5  ;;  %2604 = vmatprep.subr.mxu0 %v2798_v5 }
 0x2fc   : > { %2570 = vmatpush3.msra.mxu1 %v1824_v2  ;;  %2605 = vmatpush3.msra.mxu0 %v1840_v3 }
 0x2fd   : > { %2571 = vmatprep.subr.mxu1 %v2798_v5  ;;  %2606 = vmatprep.subr.mxu0 %v2798_v5 }
 0x2fe   : > { %2572 = vmatpush3.msra.mxu1 %v1823_v4  ;;  %2607 = vmatpush3.msra.mxu0 %v1839_v6 }
 0x2ff   : > { %2573 = vmatprep.subr.mxu1 %v2798_v5  ;;  %2608 = vmatprep.subr.mxu0 %v2798_v5 }
 0x300   : > { %2574 = vmatpush3.msra.mxu1 %v1822_v8  ;;  %2609 = vmatpush3.msra.mxu0 %v1838_v9 }
 0x301   : > { %2575 = vmatprep.subr.mxu1 %v2798_v5  ;;  %2610 = vmatprep.subr.mxu0 %v2798_v5 }
 0x302   : > { %2576 = vmatpush3.msra.mxu1 %v1821_v10  ;;  %2611 = vmatpush3.msra.mxu0 %v1837_v11 }
 0x303   : > { %2577 = vmatprep.subr.mxu1 %v2798_v5  ;;  %2612 = vmatprep.subr.mxu0 %v2798_v5 }
 0x304   : > { %2578 = vmatpush3.msra.mxu1 %v1820_v13  ;;  %2613 = vmatpush3.msra.mxu0 %v1836_v14 }
 0x305   : > { %2579 = vmatprep.subr.mxu1 %v2798_v5  ;;  %2614 = vmatprep.subr.mxu0 %v2798_v5 }
 0x306   : > { %2580 = vmatpush3.msra.mxu1 %v1819_v15  ;;  %2615 = vmatpush3.msra.mxu0 %v1835_v16 }
 0x307   : > { %2581 = vmatprep.subr.mxu1 %v2798_v5  ;;  %2616 = vmatprep.subr.mxu0 %v2798_v5 }
 0x308   : > { %2582 = vmatpush3.msra.mxu1 %v1818_v17  ;;  %2617 = vmatpush3.msra.mxu0 %v1834_v18 }
 0x309   : > { %2583 = vmatprep.subr.mxu1 %v2798_v5  ;;  %2618 = vmatprep.subr.mxu0 %v2798_v5 }
 0x30a   : > { %2584 = vmatpush3.msra.mxu1 %v1817_v19  ;;  %2587 = vmatprep.mubr.msk.f32.mxu1 %vm2799_vm6, %v2798_v5 }
 0x30b   : > { %2585 = vmatprep.subr.mxu1 %v2798_v5  ;;  %2622 = vmatprep.mubr.msk.f32.mxu0 %vm2799_vm6, %v2798_v5 }
 0x30c   : > { %2586 = vmatpush3.msra.mxu1 %v1816_v20  ;;  %2619 = vmatpush3.msra.mxu0 %v1833_v21 }
 0x30d   : > { %2620 = vmatprep.subr.mxu0 %v2798_v5  ;;  %2625 = vmatprep.subr.mxu1 %v2798_v5 }
 0x30e   : > { %2621 = vmatpush3.msra.mxu0 %v1832_v22 }
 0x30f   : > { %2660 = vmatprep.subr.mxu0 %v2798_v5 }
 0x3ac   : > { %v1736_v23 = vpop.f32.mrf.mxu0  ;;  %v1811_v24 = vpop.f32.mrf.mxu1 }
 0x3ad   : > { %v3788_v25 = vmax.f32 %v1736_v23, %v1811_v24 }
 0x3ae   : > { %v2549_v27 = vpop.f32.mrf.mxu0  ;;  %v2554_v28 = vpop.f32.mrf.mxu1 }
 0x3af   : > { %2588 = vmatmul.mubr.f32.vlgmr.msra.gmra.mxu1 %v3788_v25  ;;  %v1953_v29 = vrot.slane %v3788_v25, 1  ;;  %v2026_v36 = vrot.slane %v3788_v25, 2  ;;  %v2099_v59 = vrot.slane %v3788_v25, 3 }
 0x3b0   : > { %2626 = vmatpush3.msra.mxu1 %v1863_v26  ;;  %2657 = vmatprep.mubr.msk.f32.mxu1 %vm2799_vm6, %v2798_v5 }
 0x3b1   : > { %2627 = vmatprep.subr.mxu1 %v2798_v5  ;;  %2623 = vmatmul.mubr.f32.vlgmr.msra.gmra.mxu0 %v1953_v29 }
 0x3b2   : > { %2628 = vmatpush3.msra.mxu1 %v1862_v30  ;;  %2661 = vmatpush3.msra.mxu0 %v1879_v31 }
 0x3b3   : > { %2629 = vmatprep.subr.mxu1 %v2798_v5  ;;  %2662 = vmatprep.subr.mxu0 %v2798_v5 }
 0x3b4   : > { %2630 = vmatpush3.msra.mxu1 %v1861_v32  ;;  %2663 = vmatpush3.msra.mxu0 %v1878_v33 }
 0x3b5   : > { %2631 = vmatprep.subr.mxu1 %v2798_v5  ;;  %2664 = vmatprep.subr.mxu0 %v2798_v5 }
 0x3b6   : > { %2632 = vmatpush3.msra.mxu1 %v1860_v34  ;;  %2665 = vmatpush3.msra.mxu0 %v1877_v35 }
 0x3b7   : > { %2633 = vmatprep.subr.mxu1 %v2798_v5  ;;  %2666 = vmatprep.subr.mxu0 %v2798_v5 }
 0x3b8   : > { %2634 = vmatpush3.msra.mxu1 %v1859_v51  ;;  %2667 = vmatpush3.msra.mxu0 %v1876_v37 }
 0x3b9   : > { %2635 = vmatprep.subr.mxu1 %v2798_v5  ;;  %2668 = vmatprep.subr.mxu0 %v2798_v5 }
 0x3ba   : > { %2636 = vmatpush3.msra.mxu1 %v1858_v39  ;;  %2669 = vmatpush3.msra.mxu0 %v1875_v40 }
 0x3bb   : > { %2637 = vmatprep.subr.mxu1 %v2798_v5  ;;  %2670 = vmatprep.subr.mxu0 %v2798_v5 }
 0x3bc   : > { %2638 = vmatpush3.msra.mxu1 %v1857_v41  ;;  %2671 = vmatpush3.msra.mxu0 %v1874_v42 }
 0x3bd   : > { %2639 = vmatprep.subr.mxu1 %v2798_v5  ;;  %2672 = vmatprep.subr.mxu0 %v2798_v5 }
 0x3be   : > { %2640 = vmatpush3.msra.mxu1 %v1856_v43  ;;  %2673 = vmatpush3.msra.mxu0 %v1873_v44 }
 0x3bf   : > { %2641 = vmatprep.subr.mxu1 %v2798_v5  ;;  %2674 = vmatprep.subr.mxu0 %v2798_v5 }
 0x3c0   : > { %2642 = vmatpush3.msra.mxu1 %v1855_v45  ;;  %2675 = vmatpush3.msra.mxu0 %v1872_v46 }
 0x3c1   : > { %2643 = vmatprep.subr.mxu1 %v2798_v5  ;;  %2676 = vmatprep.subr.mxu0 %v2798_v5 }
 0x3c2   : > { %2644 = vmatpush3.msra.mxu1 %v1854_v47  ;;  %2677 = vmatpush3.msra.mxu0 %v1871_v48 }
 0x3c3   : > { %2645 = vmatprep.subr.mxu1 %v2798_v5  ;;  %2678 = vmatprep.subr.mxu0 %v2798_v5 }
 0x3c4   : > { %2646 = vmatpush3.msra.mxu1 %v1853_v49  ;;  %2679 = vmatpush3.msra.mxu0 %v1870_v50 }
 0x3c5   : > { %2647 = vmatprep.subr.mxu1 %v2798_v5  ;;  %2680 = vmatprep.subr.mxu0 %v2798_v5 }
 0x3c6   : > { %2648 = vmatpush3.msra.mxu1 %v1852_v52  ;;  %2681 = vmatpush3.msra.mxu0 %v1869_v53 }
 0x3c7   : > { %2649 = vmatprep.subr.mxu1 %v2798_v5  ;;  %2682 = vmatprep.subr.mxu0 %v2798_v5 }
 0x3c8   : > { %2650 = vmatpush3.msra.mxu1 %v1851_v54  ;;  %2683 = vmatpush3.msra.mxu0 %v1868_v7 }
 0x3c9   : > { %2651 = vmatprep.subr.mxu1 %v2798_v5  ;;  %2684 = vmatprep.subr.mxu0 %v2798_v5 }
 0x3ca   : > { %2652 = vmatpush3.msra.mxu1 %v1850_v60  ;;  %2685 = vmatpush3.msra.mxu0 %v1867_v12 }
 0x3cb   : > { %2653 = vmatprep.subr.mxu1 %v2798_v5  ;;  %2686 = vmatprep.subr.mxu0 %v2798_v5 }
 0x3cc   : > { %2654 = vmatpush3.msra.mxu1 %v1849_v55  ;;  %2687 = vmatpush3.msra.mxu0 %v1866_v38 }
 0x3cd   : > { %2655 = vmatprep.subr.mxu1 %v2798_v5  ;;  %2688 = vmatprep.subr.mxu0 %v2798_v5 }
 0x3ce   : > { %2656 = vmatpush3.msra.mxu1 %v1848_v56  ;;  %2689 = vmatpush3.msra.mxu0 %v1865_v57 }
 0x3cf   : > { %2658 = vmatmul.mubr.f32.vlgmr.msra.gmra.mxu1 %v2026_v36  ;;  %2690 = vmatprep.subr.mxu0 %v2798_v5 }
 0x3d0   : > { %2691 = vmatpush3.msra.mxu0 %v1864_v58  ;;  %2692 = vmatprep.mubr.msk.f32.mxu0 %vm2799_vm6, %v2798_v5 }
 0x3d1   : > { %2693 = vmatmul.mubr.f32.vlgmr.msra.gmra.mxu0 %v2099_v59 }
 0x46f   : > { %v1947_v61 = vpop.f32.mrf.mxu1 }
 0x470   : > { %v1951_v2 = vadd.f32 %v1947_v61, %v1880_v1 }
 0x471   : > { %v2589_v62 = vpop.f32.mrf.mxu1  ;;  %v2021_v63 = vpop.f32.mrf.mxu0 }
 0x472   : > { %v2025_v3 = vadd.f32 %v2021_v63, %v1951_v2 }
 0x473   : > { %v2624_v0 = vpop.f32.mrf.mxu0 }
 0x48f   : > { %v2094_v4 = vpop.f32.mrf.mxu1 }
 0x490   : > { %v2098_v6 = vadd.f32 %v2094_v4, %v2025_v3 }
 0x491   : > { %v2659_v8 = vpop.f32.mrf.mxu1  ;;  %v2167_v5 = vpop.f32.mrf.mxu0 }
 0x492   : > { %v2171_v9 = vadd.f32 %v2167_v5, %v2098_v6 }
 0x493   : > { %v2694_v10 = vpop.f32.mrf.mxu0 }
 0x494   : > { %2172 = vst [vmem:[%s324_s21] sm:$0x1] %v2171_v9 }
 0x495   : > { %2749 = shalt.err (!%p2746_p3)
}
 0x496   : > { %s2750_s26 = scalar_lea.hbm %s3932_s17, 16  ;;  %s2754_s29 = scalar_lea.hbm %s3976_s9, 32 }
 0x497   : > { %p2751_p4 = scmp.ne.s32.totalorder %s3932_s17, %s2750_s26  ;;  %p2755_p9 = scmp.lt.s32.totalorder %s3932_s17, %s3976_s9 }
 0x498   : > { %p2756_p10 = scmp.lt.s32.totalorder %s2754_s29, %s2750_s26 }
 0x499   : > { %p2752_p7 = pnand %p2751_p4, %p2889_p5 }
 0x49a   : > { %p2757_p11 = por %p2756_p10, %p2755_p9 }
 0x49b   : > { %p2753_p8 = pneg %p2752_p7 }
 0x49d   : > { %p2758_p12 = pnand %p2757_p11, %p2753_p8 }
 0x49f   : > { %2761 = shalt.err (!%p2758_p12)
}
 0x4a0   : > { %2695 = dma.vmem_to_hbm [thread:$0]  (%p2889_p5), %s2187_s14, 16, %s3932_s17, %s2174_s22  }
 0x4a1 PF: > { %p2701_p13 = scmp.ge.s32.totalorder %s2796_s12, 2  ;;  %s2198_s16 = sand.u32 1, %s2784_s30  }
 0x4a2   : > { %s2199_s23 = scalar_lea.sflag [#allocation3], %s2198_s16 }
 0x4a3   : > { %p2698_p0 = pnand %p2701_p13, %p2893_p6 }
 0x4a5   : > { %p2699_p1 = pneg %p2698_p0 }
 0x4a7   : > { %2779 = dma.done.wait (%p2699_p1), %s2199_s23, 16  }
 0x4a8   : > { %2781 = vsyncadd (%p2699_p1), %s2199_s23, 4294967280  ;;  %s3980_s13 = sld [smem:[#allocation5_spill]]  ;;  %p19_p2 = scmp.ge.s32.totalorder %s2876_s15, 4  }
 0x4a9   : > { %s3981_s30 = smov %s2788_s10  ;;  %s3982_s10 = smov %s2792_s11 }
 0x4aa   : > { %s3984_s12 = smov %s2876_s15  ;;  %21 = sbr.rel (!%p19_p2) target bundleno = 3 (0x3), region = 101 }
 0x4ae   : > { %s3983_s11 = smov %s3980_s13 }
 0x4af   :  { %2203 = vsyncpa [#allocation3], 1 }
 0x4b0   :  { %2205 = vsyncpa [#allocation3 + $0x1], 1 }

</bundles_post_ra>
